<compile_context>
chip_gen: v7x
topology: tpu7x:2x2x1
jax: 0.10.0
libtpu: 0.0.40
codegen_flags: <defaults>
</compile_context>

<pallas_src>
import functools

import jax
import jax.numpy as jnp
from jax.experimental import pallas as pl
from jax.experimental.pallas import tpu as pltpu


def _round_up(x, m):
    return (x + m - 1) // m * m


def _codecnn_kernel(code_ref, w2_ref, p_ref, out_ref, *, K, Lo, n_valid):
    # code_ref : (B*Lp, T)  int32  -- per-(batch, position) code ids over visits
    # w2_ref   : (K*Vp, Rp) bf16   -- embedding folded into im2col conv weight
    # p_ref    : (3, Rp)    f32    -- [conv bias; bn gamma; bn beta], zero-padded
    # out_ref  : (B, Rp)    f32
    BLp, T = code_ref.shape
    KVp, Rp = w2_ref.shape
    Vp = KVp // K
    B = out_ref.shape[0]
    Lp = BLp // B
    eps = 1e-5

    # --- one-hot visit counts over the padded vocab (int accumulate, 1 cast) --
    # counts[b*Lp+l, v] = #{t : code[b,t,l] == v}.  ids >= Vp match nothing;
    # ids in [V, Vp) hit zero-padded W2 rows -> contribute 0 (i.e. padding).
    code = code_ref[...]                                          # (BLp, T)
    v_iota = jax.lax.broadcasted_iota(jnp.int32, (BLp, Vp), 1)
    cnt = jnp.zeros((BLp, Vp), jnp.int32)
    for t in range(T):                                            # static, small T
        cnt = cnt + (code[:, t:t + 1] == v_iota).astype(jnp.int32)
    counts = cnt.astype(jnp.float32)

    # --- im2col on counts via lane-aligned rolled (XLU) views -----------------
    # shifted_k[j, v] = counts[j + k, v]; wrap-around rows only land on output
    # positions j >= Lo, which are masked out below.
    shifted = [counts.astype(jnp.bfloat16)]
    for k in range(1, K):
        shifted.append(
            pltpu.roll(counts, shift=BLp - k, axis=0).astype(jnp.bfloat16))
    counts_col = jnp.concatenate(shifted, axis=1)                 # (BLp, K*Vp)

    # --- Conv1d (embedding folded in) as ONE deep MXU matmul ------------------
    conv = jnp.dot(counts_col, w2_ref[...],
                   preferred_element_type=jnp.float32)            # (BLp, Rp)
    p = p_ref[...]                                                # (3, Rp)
    conv = conv + p[0:1, :]                                       # conv bias

    # --- valid-output-row mask (j < Lo within each batch row block) -----------
    valid = (jax.lax.broadcasted_iota(jnp.int32, (B, Lp, Rp), 1)
             .reshape(BLp, Rp) < Lo)

    # --- BatchNorm1d: training-mode batch stats, single sum/sumsq pass --------
    cm = jnp.where(valid, conv, 0.0)
    s = jnp.sum(cm, axis=0, keepdims=True)                        # (1, Rp)
    ss = jnp.sum(cm * cm, axis=0, keepdims=True)                  # (1, Rp)
    inv_n = 1.0 / float(n_valid)
    mean = s * inv_n
    var = ss * inv_n - mean * mean                                # biased variance
    y = (conv - mean) * jax.lax.rsqrt(var + eps) * p[1:2, :] + p[2:3, :]

    # --- AdaptiveMaxPool1d(1): mask pad rows, layout-free reshape, axis max ---
    y = jnp.where(valid, y, -jnp.inf)
    out_ref[...] = jnp.max(y.reshape(B, Lp, Rp), axis=1).astype(out_ref.dtype)


def codecnn_forward(code, embed_tbl, conv_w, conv_b, bn_gamma, bn_beta):
    B, T, L = code.shape
    V, E = embed_tbl.shape
    R, _, K = conv_w.shape
    Lo = L - K + 1                       # valid conv output length
    Lp = _round_up(L, 8)                 # sublane-aligned positions per batch
    Vp = _round_up(max(V, 128), 128)     # lane-dense vocab
    Rp = _round_up(max(R, 128), 128)     # lane-dense channels
    BLp = B * Lp

    # (b, l) positions as rows of visit ids; pad positions with padding_idx=0.
    code2 = jnp.transpose(code, (0, 2, 1)).astype(jnp.int32)      # (B, L, T)
    code2 = jnp.pad(code2, ((0, 0), (0, Lp - L), (0, 0))).reshape(BLp, T)

    # Fold embedding into the conv weight (parameter-only preprocessing):
    #   W2[k, v, r] = sum_e embed[v, e] * conv_w[r, e, k]
    # padding_idx=0 is honoured because embed row 0 is zero -> W2[:, 0, :] = 0.
    w2 = jnp.einsum('ve,rek->kvr', embed_tbl.astype(jnp.float32),
                    conv_w.astype(jnp.float32))                   # (K, V, R)
    w2 = jnp.pad(w2, ((0, 0), (0, Vp - V), (0, Rp - R)))
    w2 = w2.reshape(K * Vp, Rp).astype(jnp.bfloat16)

    # conv bias + BN affine packed into one zero-padded VMEM input (one DMA).
    params = jnp.stack([
        jnp.pad(conv_b.astype(jnp.float32), (0, Rp - R)),
        jnp.pad(bn_gamma.astype(jnp.float32), (0, Rp - R)),
        jnp.pad(bn_beta.astype(jnp.float32), (0, Rp - R)),
    ], axis=0)                                                    # (3, Rp)

    kernel = functools.partial(_codecnn_kernel, K=K, Lo=Lo, n_valid=B * Lo)
    vmem = pl.BlockSpec(memory_space=pltpu.MemorySpace.VMEM)
    out = pl.pallas_call(
        kernel,
        out_shape=jax.ShapeDtypeStruct((B, Rp), jnp.float32),
        in_specs=[vmem, vmem, vmem],
        out_specs=vmem,
        cost_estimate=pl.CostEstimate(
            flops=2 * BLp * (K * Vp) * Rp + T * BLp * Vp,
            transcendentals=Rp,
            bytes_accessed=(code2.size * 4 + w2.size * 2
                            + params.size * 4 + B * Rp * 4),
        ),
    )(code2, w2, params)
    return out[:, :R]


if __name__ == "__main__":
    key = jax.random.PRNGKey(0)
    B, T, L = 4, 6, 32            # batch, visits, code_seq_len
    V, E, R, K = 50, 16, 32, 10   # code_vocab_size, embed_size, rnn_size, conv k
    k1, k2, k3, k4, k5, k6 = jax.random.split(key, 6)

    code = jax.random.randint(k1, (B, T, L), 0, V, dtype=jnp.int32)

    # Deterministic synthetic parameters (shapes from CodeCNN.build()).
    embed_tbl = 0.1 * jax.random.normal(k2, (V, E), jnp.float32)
    embed_tbl = embed_tbl.at[0].set(0.0)                     # padding_idx = 0
    conv_w = 0.1 * jax.random.normal(k3, (R, E, K), jnp.float32)
    conv_b = 0.1 * jax.random.normal(k4, (R,), jnp.float32)
    bn_gamma = 1.0 + 0.1 * jax.random.normal(k5, (R,), jnp.float32)
    bn_beta = 0.1 * jax.random.normal(k6, (R,), jnp.float32)

    out = jax.block_until_ready(
        codecnn_forward(code, embed_tbl, conv_w, conv_b, bn_gamma, bn_beta))
    assert out.shape == (B, R), out.shape

    # Pure-JAX f32 reference of the same forward semantics.
    # (Note: jnp.take clamps OOB indices where torch.nn.Embedding would error;
    #  inputs here are always in-range.  Tolerance is 1e-2 because the kernel's
    #  matmul operands are bf16 per the performance review; BN division by the
    #  batch std amplifies the ~1e-3 bf16 rounding of the folded weights.)
    emb = jnp.take(embed_tbl, code, axis=0).sum(axis=1).transpose(0, 2, 1)
    ref_conv = jax.lax.conv_general_dilated(
        emb, conv_w, (1,), "VALID", dimension_numbers=("NCH", "OIH", "NCH"))
    ref_conv = ref_conv + conv_b[None, :, None]
    m = ref_conv.mean(axis=(0, 2), keepdims=True)
    v = jnp.mean((ref_conv - m) ** 2, axis=(0, 2), keepdims=True)
    ref = ((ref_conv - m) * jax.lax.rsqrt(v + 1e-5) * bn_gamma[None, :, None]
           + bn_beta[None, :, None]).max(axis=2)
    assert jnp.allclose(out, ref, rtol=1e-2, atol=1e-2), \
        float(jnp.max(jnp.abs(out - ref)))

    print("KERNEL_OK")
</pallas_src>

<mosaic_0001>
module attributes {stable_mosaic.version = 11 : i64} {
  func.func @_codecnn_kernel(%arg0: memref<128x6xi32, #tpu.memory_space<vmem>>, %arg1: memref<1280x128xbf16, #tpu.memory_space<vmem>>, %arg2: memref<3x128xf32, #tpu.memory_space<vmem>>, %arg3: memref<4x128xf32, #tpu.memory_space<vmem>>) attributes {dimension_semantics = [], scalar_prefetch = 0 : i64, scratch_operands = 0 : i64, tpu.core_type = #tpu.core_type<tc>} {
    %c0 = arith.constant 0 : index
    %c0_0 = arith.constant 0 : index
    %0 = vector.load %arg0[%c0, %c0_0] : memref<128x6xi32, #tpu.memory_space<vmem>>, vector<128x6xi32>
    %1 = tpu.iota {dimensions = array<i32: 1>} : vector<128x128xi32>
    %c0_i32 = arith.constant 0 : i32
    %2 = vector.broadcast %c0_i32 : i32 to vector<128x128xi32>
    %3 = vector.extract_strided_slice %0 {offsets = [0, 0], sizes = [128, 1], strides = [1, 1]} : vector<128x6xi32> to vector<128x1xi32>
    %4 = vector.broadcast %3 : vector<128x1xi32> to vector<128x128xi32>
    %5 = arith.cmpi eq, %4, %1 : vector<128x128xi32>
    %6 = arith.extui %5 : vector<128x128xi1> to vector<128x128xi32>
    %7 = arith.addi %2, %6 : vector<128x128xi32>
    %8 = vector.extract_strided_slice %0 {offsets = [0, 1], sizes = [128, 1], strides = [1, 1]} : vector<128x6xi32> to vector<128x1xi32>
    %9 = vector.broadcast %8 : vector<128x1xi32> to vector<128x128xi32>
    %10 = arith.cmpi eq, %9, %1 : vector<128x128xi32>
    %11 = arith.extui %10 : vector<128x128xi1> to vector<128x128xi32>
    %12 = arith.addi %7, %11 : vector<128x128xi32>
    %13 = vector.extract_strided_slice %0 {offsets = [0, 2], sizes = [128, 1], strides = [1, 1]} : vector<128x6xi32> to vector<128x1xi32>
    %14 = vector.broadcast %13 : vector<128x1xi32> to vector<128x128xi32>
    %15 = arith.cmpi eq, %14, %1 : vector<128x128xi32>
    %16 = arith.extui %15 : vector<128x128xi1> to vector<128x128xi32>
    %17 = arith.addi %12, %16 : vector<128x128xi32>
    %18 = vector.extract_strided_slice %0 {offsets = [0, 3], sizes = [128, 1], strides = [1, 1]} : vector<128x6xi32> to vector<128x1xi32>
    %19 = vector.broadcast %18 : vector<128x1xi32> to vector<128x128xi32>
    %20 = arith.cmpi eq, %19, %1 : vector<128x128xi32>
    %21 = arith.extui %20 : vector<128x128xi1> to vector<128x128xi32>
    %22 = arith.addi %17, %21 : vector<128x128xi32>
    %23 = vector.extract_strided_slice %0 {offsets = [0, 4], sizes = [128, 1], strides = [1, 1]} : vector<128x6xi32> to vector<128x1xi32>
    %24 = vector.broadcast %23 : vector<128x1xi32> to vector<128x128xi32>
    %25 = arith.cmpi eq, %24, %1 : vector<128x128xi32>
    %26 = arith.extui %25 : vector<128x128xi1> to vector<128x128xi32>
    %27 = arith.addi %22, %26 : vector<128x128xi32>
    %28 = vector.extract_strided_slice %0 {offsets = [0, 5], sizes = [128, 1], strides = [1, 1]} : vector<128x6xi32> to vector<128x1xi32>
    %29 = vector.broadcast %28 : vector<128x1xi32> to vector<128x128xi32>
    %30 = arith.cmpi eq, %29, %1 : vector<128x128xi32>
    %31 = arith.extui %30 : vector<128x128xi1> to vector<128x128xi32>
    %32 = arith.addi %27, %31 : vector<128x128xi32>
    %33 = arith.sitofp %32 : vector<128x128xi32> to vector<128x128xf32>
    %34 = arith.truncf %33 : vector<128x128xf32> to vector<128x128xbf16>
    %c127_i32 = arith.constant 127 : i32
    %35 = tpu.dynamic_rotate %33 by %c127_i32 dim 0 : vector<128x128xf32>, i32 -> vector<128x128xf32>
    %36 = arith.truncf %35 : vector<128x128xf32> to vector<128x128xbf16>
    %c126_i32 = arith.constant 126 : i32
    %37 = tpu.dynamic_rotate %33 by %c126_i32 dim 0 : vector<128x128xf32>, i32 -> vector<128x128xf32>
    %38 = arith.truncf %37 : vector<128x128xf32> to vector<128x128xbf16>
    %c125_i32 = arith.constant 125 : i32
    %39 = tpu.dynamic_rotate %33 by %c125_i32 dim 0 : vector<128x128xf32>, i32 -> vector<128x128xf32>
    %40 = arith.truncf %39 : vector<128x128xf32> to vector<128x128xbf16>
    %c124_i32 = arith.constant 124 : i32
    %41 = tpu.dynamic_rotate %33 by %c124_i32 dim 0 : vector<128x128xf32>, i32 -> vector<128x128xf32>
    %42 = arith.truncf %41 : vector<128x128xf32> to vector<128x128xbf16>
    %c123_i32 = arith.constant 123 : i32
    %43 = tpu.dynamic_rotate %33 by %c123_i32 dim 0 : vector<128x128xf32>, i32 -> vector<128x128xf32>
    %44 = arith.truncf %43 : vector<128x128xf32> to vector<128x128xbf16>
    %c122_i32 = arith.constant 122 : i32
    %45 = tpu.dynamic_rotate %33 by %c122_i32 dim 0 : vector<128x128xf32>, i32 -> vector<128x128xf32>
    %46 = arith.truncf %45 : vector<128x128xf32> to vector<128x128xbf16>
    %c121_i32 = arith.constant 121 : i32
    %47 = tpu.dynamic_rotate %33 by %c121_i32 dim 0 : vector<128x128xf32>, i32 -> vector<128x128xf32>
    %48 = arith.truncf %47 : vector<128x128xf32> to vector<128x128xbf16>
    %c120_i32 = arith.constant 120 : i32
    %49 = tpu.dynamic_rotate %33 by %c120_i32 dim 0 : vector<128x128xf32>, i32 -> vector<128x128xf32>
    %50 = arith.truncf %49 : vector<128x128xf32> to vector<128x128xbf16>
    %c119_i32 = arith.constant 119 : i32
    %51 = tpu.dynamic_rotate %33 by %c119_i32 dim 0 : vector<128x128xf32>, i32 -> vector<128x128xf32>
    %52 = arith.truncf %51 : vector<128x128xf32> to vector<128x128xbf16>
    %53 = tpu.concatenate %34, %36, %38, %40, %42, %44, %46, %48, %50, %52 in 1 : vector<128x128xbf16>, vector<128x128xbf16>, vector<128x128xbf16>, vector<128x128xbf16>, vector<128x128xbf16>, vector<128x128xbf16>, vector<128x128xbf16>, vector<128x128xbf16>, vector<128x128xbf16>, vector<128x128xbf16> -> vector<128x1280xbf16>
    %c0_1 = arith.constant 0 : index
    %c0_2 = arith.constant 0 : index
    %54 = vector.load %arg1[%c0_1, %c0_2] : memref<1280x128xbf16, #tpu.memory_space<vmem>>, vector<1280x128xbf16>
    %cst = arith.constant dense<0.000000e+00> : vector<128x128xf32>
    %55 = tpu.matmul %53, %54, %cst {dimension_numbers = #tpu.dot_dimension_numbers<[1], [0], [0], [1], [0, 0, 1, 1], [], []>} : vector<128x1280xbf16>, vector<1280x128xbf16>, vector<128x128xf32> -> vector<128x128xf32>
    %c0_3 = arith.constant 0 : index
    %c0_4 = arith.constant 0 : index
    %56 = vector.load %arg2[%c0_3, %c0_4] : memref<3x128xf32, #tpu.memory_space<vmem>>, vector<3x128xf32>
    %57 = vector.extract_strided_slice %56 {offsets = [0, 0], sizes = [1, 128], strides = [1, 1]} : vector<3x128xf32> to vector<1x128xf32>
    %58 = vector.broadcast %57 : vector<1x128xf32> to vector<128x128xf32>
    %59 = arith.addf %55, %58 : vector<128x128xf32>
    %60 = tpu.iota {dimensions = array<i32: 1>} : vector<4x32x128xi32>
    %61 = vector.shape_cast %60 : vector<4x32x128xi32> to vector<128x128xi32>
    %c23_i32 = arith.constant 23 : i32
    %62 = vector.broadcast %c23_i32 : i32 to vector<128x128xi32>
    %63 = arith.cmpi slt, %61, %62 : vector<128x128xi32>
    %cst_5 = arith.constant 0.000000e+00 : f32
    %64 = vector.broadcast %cst_5 : f32 to vector<128x128xf32>
    %65 = arith.select %63, %59, %64 : vector<128x128xi1>, vector<128x128xf32>
    %cst_6 = arith.constant dense<0.000000e+00> : vector<128xf32>
    %66 = vector.multi_reduction <add>, %65, %cst_6 [0] : vector<128x128xf32> to vector<128xf32>
    %67 = vector.shape_cast %66 : vector<128xf32> to vector<1x128xf32>
    %68 = arith.mulf %65, %65 : vector<128x128xf32>
    %cst_7 = arith.constant dense<0.000000e+00> : vector<128xf32>
    %69 = vector.multi_reduction <add>, %68, %cst_7 [0] : vector<128x128xf32> to vector<128xf32>
    %70 = vector.shape_cast %69 : vector<128xf32> to vector<1x128xf32>
    %cst_8 = arith.constant 0.0108695654 : f32
    %71 = vector.broadcast %cst_8 : f32 to vector<1x128xf32>
    %72 = arith.mulf %67, %71 : vector<1x128xf32>
    %cst_9 = arith.constant 0.0108695654 : f32
    %73 = vector.broadcast %cst_9 : f32 to vector<1x128xf32>
    %74 = arith.mulf %70, %73 : vector<1x128xf32>
    %75 = arith.mulf %72, %72 : vector<1x128xf32>
    %76 = arith.subf %74, %75 : vector<1x128xf32>
    %77 = vector.broadcast %72 : vector<1x128xf32> to vector<128x128xf32>
    %78 = arith.subf %59, %77 : vector<128x128xf32>
    %cst_10 = arith.constant 9.99999974E-6 : f32
    %79 = vector.broadcast %cst_10 : f32 to vector<1x128xf32>
    %80 = arith.addf %76, %79 : vector<1x128xf32>
    %81 = math.rsqrt %80 : vector<1x128xf32>
    %82 = vector.broadcast %81 : vector<1x128xf32> to vector<128x128xf32>
    %83 = arith.mulf %78, %82 : vector<128x128xf32>
    %84 = vector.extract_strided_slice %56 {offsets = [1, 0], sizes = [1, 128], strides = [1, 1]} : vector<3x128xf32> to vector<1x128xf32>
    %85 = vector.broadcast %84 : vector<1x128xf32> to vector<128x128xf32>
    %86 = arith.mulf %83, %85 : vector<128x128xf32>
    %87 = vector.extract_strided_slice %56 {offsets = [2, 0], sizes = [1, 128], strides = [1, 1]} : vector<3x128xf32> to vector<1x128xf32>
    %88 = vector.broadcast %87 : vector<1x128xf32> to vector<128x128xf32>
    %89 = arith.addf %86, %88 : vector<128x128xf32>
    %cst_11 = arith.constant 0xFF800000 : f32
    %90 = vector.broadcast %cst_11 : f32 to vector<128x128xf32>
    %91 = arith.select %63, %89, %90 : vector<128x128xi1>, vector<128x128xf32>
    %92 = vector.shape_cast %91 : vector<128x128xf32> to vector<4x32x128xf32>
    %cst_12 = arith.constant dense<0xFF800000> : vector<4x128xf32>
    %93 = vector.multi_reduction <maximumf>, %92, %cst_12 [1] : vector<4x32x128xf32> to vector<4x128xf32>
    %c0_13 = arith.constant 0 : index
    %c0_14 = arith.constant 0 : index
    %94 = vector.load %arg3[%c0_13, %c0_14] : memref<4x128xf32, #tpu.memory_space<vmem>>, vector<4x128xf32>
    tpu.vector_store %arg3[%c0_13, %c0_14], %93 {strides = array<i32>} : memref<4x128xf32, #tpu.memory_space<vmem>>, vector<4x128xf32>,
    return
  }
}

</mosaic_0001>

<bundles_post_ra>
// kernel: tpu_custom_call.1
= control target key start
LH: loop header
LB: loop body
LE: loop exit
PB: predicated region body
PF: predicated region fallthrough
CT: control target
= control target key end

     0   :  { %8 = vsyncpa [#allocation3], 0  ;;  %s4719_s0 = inlined_call_operand.vmem [shape: s32[128,6], index: 0, kind: input, shape index: {}]   ;;  %s4720_s1 = inlined_call_operand.hbm [shape: bf16[1280,128], index: 1, kind: input, shape index: {}]   ;;  %s4721_s2 = inlined_call_operand.vmem [shape: f32[3,128], index: 2, kind: input, shape index: {}]   ;;  %s4722_s3 = inlined_call_operand.hbm [shape: f32[4,128], index: 3, kind: output, shape index: {}]  }
   0x1   :  { %9 = vsyncpa [#allocation4], 0  ;;  %s2909_s12 = smov [#allocation2]   ;;  %s2861_s16 = scalar_lea.hbm %s4720_s1, 10240 }
   0x2   :  { %s17_s13 = sshll.u32 %s2909_s12, 4  ;;  %p2862_p0 = scmp.ne.s32.totalorder %s4720_s1, %s2861_s16  ;;  %s18_s13 = int_to_ptr.vmem [resolvable:$true] %s17_s13 }
   0x3   :  { %p2865_p1 = scmp.lt.u32.totalorder %s2861_s16, %s4720_s1 }
   0x5   :  { %p2867_p2 = pnand %p2865_p1, %p2862_p0 }
   0x7   :  { %2870 = shalt.err (!%p2867_p2)
}
   0x8   :  { %s2871_s21 = scalar_lea.vmem %s18_s13, 10240  ;;  %p2876_p4 = scmp.lt.s32.totalorder %s18_s13, %s18_s13 }
   0x9   :  { %p2872_p3 = scmp.ne.s32.totalorder %s18_s13, %s2871_s21  ;;  %p2877_p5 = scmp.lt.s32.totalorder %s2871_s21, %s2871_s21 }
   0xb   :  { %p2878_p6 = por %p2877_p5, %p2876_p4 }
   0xd   :  { %p2879_p7 = pnand %p2878_p6, %p2872_p3 }
   0xf   :  { %2882 = shalt.err (!%p2879_p7)
}
  0x10   :  { %s2910_s22 = smov 64   ;;  %s2911_s23 = smov 4  }
  0x11   :  { %23 = dma.hbm_to_vmem [thread:$0]  %s4720_s1, 10240, %s18_s13, [#allocation3], %s2910_s22, %s2910_s22, %s2911_s23  }
  0x12   :  { %2905 = dma.done.wait [#allocation3], 10240  }
  0x13   :  { %2906 = vsyncadd [#allocation3], 4294957056  ;;  %v2912_v0 = vmov 3   ;;  %v4740_v1 = vmov 0   ;;  %v2956_v2 = vld [vmem:[%s4719_s0 + $0x50] sm:$0xff]  ;;  %v2961_v3 = vld [vmem:[%s4719_s0 + $0x40] sm:$0xff]  ;;  %v46_v48 = vlaneseq }
  0x14   :  { %2736 = vset.pattern.permute.xlu0 %v2912_v0  ;;  %2731 = vset.pattern.permute.xlu1 %v4740_v1  ;;  %v2968_v4 = vld [vmem:[%s4719_s0] sm:$0xff]  ;;  %v2973_v5 = vld [vmem:[%s4719_s0 + $0x10] sm:$0xff]  ;;  %v2914_v6 = vmov 1   ;;  %v2984_v7 = vld [vmem:[%s4719_s0 + $0x48] sm:$0xff]  ;;  %v2915_v12 = vmov 2   ;;  %v2916_v14 = vmov 4  }
  0x15   :  { %79 = vperm.xlu1 %2731, %v2956_v2   ;;  %345 = vperm.xlu0 %2736, %v2961_v3   ;;  %v2992_v8 = vld [vmem:[%s4719_s0 + $0x8] sm:$0xff]  ;;  %v2999_v9 = vld [vmem:[%s4719_s0 + $0x60] sm:$0xff]  ;;  %v3007_v10 = vld [vmem:[%s4719_s0 + $0x18] sm:$0xff]  ;;  %v2917_v23 = vmov 5   ;;  %v3145_v51 = vand.u32 127, %v46_v48 }
  0x16   :  { %v3014_v11 = vld [vmem:[%s4719_s0 + $0x70] sm:$0xff]  ;;  %v3032_v13 = vld [vmem:[%s4719_s0 + $0x28] sm:$0xff]  ;;  %v3046_v15 = vld [vmem:[%s4719_s0 + $0x58] sm:$0xff] }
  0x17   :  { %v2779_v16 = vld [vmem:[#allocation2 + $0x40] sm:$0xff]   ;;  %v2781_v18 = vld [vmem:[#allocation2 + $0x48] sm:$0xff]   ;;  %v2783_v21 = vld [vmem:[#allocation2 + $0x50] sm:$0xff]  }
  0x18   :  { %v2780_v17 = vld [vmem:[#allocation2] sm:$0xff]   ;;  %2705 = vmatprep.subr.bf16.mxu1 %v2779_v16  ;;  %2385 = vmatprep.subr.bf16.mxu0 %v2779_v16  ;;  %v2782_v19 = vld [vmem:[#allocation2 + $0x8] sm:$0xff]   ;;  %v2784_v22 = vld [vmem:[#allocation2 + $0x10] sm:$0xff]  }
  0x19   :  { %2732 = vset.pattern.permute.xlu1 %v2914_v6  ;;  %321 = vperm.xlu0 %2736, %v2968_v4   ;;  %v3067_v20 = vld [vmem:[%s4719_s0 + $0x20] sm:$0xff]  ;;  %v2785_v24 = vld [vmem:[#allocation2 + $0x58] sm:$0xff]   ;;  %v2789_v29 = vld [vmem:[#allocation2 + $0x68] sm:$0xff]  }
  0x1a   :  { %153 = vperm.xlu1 %2732, %v2961_v3   ;;  %2713 = vmatpush3.bf16.msra.mxu1 %v2780_v17  ;;  %v2786_v25 = vld [vmem:[#allocation2 + $0x18] sm:$0xff]   ;;  %v2787_v27 = vld [vmem:[#allocation2 + $0x60] sm:$0xff]   ;;  %v2790_v30 = vld [vmem:[#allocation2 + $0x28] sm:$0xff]  }
  0x1b   :  { %2386 = vmatpush3.bf16.msra.mxu0 %v2780_v17  ;;  %2706 = vmatprep.subr.bf16.mxu1 %v2781_v18  ;;  %v3076_v26 = vld [vmem:[%s4719_s0 + $0x38] sm:$0xff]  ;;  %v2788_v28 = vld [vmem:[#allocation2 + $0x20] sm:$0xff]   ;;  %v2791_v31 = vld [vmem:[#allocation2 + $0x70] sm:$0xff]  }
  0x1c   :  { %2387 = vmatprep.subr.bf16.mxu0 %v2781_v18  ;;  %v2792_v32 = vld [vmem:[#allocation2 + $0x30] sm:$0xff]   ;;  %v2793_v33 = vld [vmem:[#allocation2 + $0x78] sm:$0xff]   ;;  %v3093_v35 = vld [vmem:[%s4719_s0 + $0x68] sm:$0xff] }
  0x1d   :  { %327 = vperm.xlu0 %2736, %v2973_v5   ;;  %v2794_v34 = vld [vmem:[#allocation2 + $0x38] sm:$0xff]   ;;  %v3100_v36 = vld [vmem:[%s4719_s0 + $0x30] sm:$0xff] }
  0x1e   :  { %159 = vperm.xlu1 %2732, %v2956_v2   ;;  %2714 = vmatpush3.bf16.msra.mxu1 %v2782_v19  ;;  %v3129_v45 = vld [vmem:[%s4719_s0 + $0x78] sm:$0xff] }
  0x1f   :  { %2388 = vmatpush3.bf16.msra.mxu0 %v2782_v19  ;;  %2707 = vmatprep.subr.bf16.mxu1 %v2783_v21 }
  0x20   :  { %2389 = vmatprep.subr.bf16.mxu0 %v2783_v21 }
  0x21   :  { %2738 = vset.pattern.permute.xlu0 %v4740_v1 }
  0x22   :  { %2733 = vset.pattern.permute.xlu1 %v4740_v1  ;;  %73 = vperm.xlu0 %2738, %v2961_v3  }
  0x23   :  { %49 = vperm.xlu1 %2733, %v2968_v4   ;;  %2715 = vmatpush3.bf16.msra.mxu1 %v2784_v22 }
  0x24   :  { %2390 = vmatpush3.bf16.msra.mxu0 %v2784_v22  ;;  %2708 = vmatprep.subr.bf16.mxu1 %v2785_v24 }
  0x25   :  { %2391 = vmatprep.subr.bf16.mxu0 %v2785_v24 }
  0x26   :  { %76 = vperm.xlu0 %2738, %v2984_v7  }
  0x27   :  { %55 = vperm.xlu1 %2733, %v2973_v5   ;;  %2716 = vmatpush3.bf16.msra.mxu1 %v2786_v25 }
  0x28   :  { %2392 = vmatpush3.bf16.msra.mxu0 %v2786_v25  ;;  %2709 = vmatprep.subr.bf16.mxu1 %v2787_v27 }
  0x29   :  { %2393 = vmatprep.subr.bf16.mxu0 %v2787_v27 }
  0x2a   :  { %52 = vperm.xlu0 %2738, %v2992_v8  }
  0x2b   :  { %2734 = vset.pattern.permute.xlu1 %v2914_v6  ;;  %2717 = vmatpush3.bf16.msra.mxu1 %v2788_v28 }
  0x2c   :  { %129 = vperm.xlu1 %2734, %v2968_v4   ;;  %2394 = vmatpush3.bf16.msra.mxu0 %v2788_v28 }
  0x2d   :  { %2710 = vmatprep.subr.bf16.mxu1 %v2789_v29  ;;  %2395 = vmatprep.subr.bf16.mxu0 %v2789_v29 }
  0x2e   :  { %85 = vperm.xlu0 %2738, %v2999_v9  }
  0x2f   :  { %2718 = vmatpush3.bf16.msra.mxu1 %v2790_v30 }
  0x30   :  { %135 = vperm.xlu1 %2734, %v2973_v5   ;;  %2396 = vmatpush3.bf16.msra.mxu0 %v2790_v30 }
  0x31   :  { %2711 = vmatprep.subr.bf16.mxu1 %v2791_v31  ;;  %2397 = vmatprep.subr.bf16.mxu0 %v2791_v31 }
  0x32   :  { %58 = vperm.xlu0 %2738, %v3007_v10  }
  0x33   :  { %2719 = vmatpush3.bf16.msra.mxu1 %v2792_v32 }
  0x34   :  { %2735 = vset.pattern.permute.xlu1 %v2915_v12  ;;  %2398 = vmatpush3.bf16.msra.mxu0 %v2792_v32 }
  0x35   :  { %249 = vperm.xlu1 %2735, %v2961_v3   ;;  %2712 = vmatprep.subr.bf16.mxu1 %v2793_v33 }
  0x36   :  { %91 = vperm.xlu0 %2738, %v3014_v11   ;;  %2399 = vmatprep.subr.bf16.mxu0 %v2793_v33 }
  0x37   :  { %2720 = vmatpush3.bf16.msra.mxu1 %v2794_v34 }
  0x38   :  { %2400 = vmatpush3.bf16.msra.mxu0 %v2794_v34 }
  0x39   :  { %255 = vperm.xlu1 %2735, %v2956_v2  }
  0x3a   :  { %2752 = vset.pattern.permute.xlu0 %v2915_v12 }
  0x3b   :  { %252 = vperm.xlu0 %2752, %v2984_v7  }
  0x3d   :  { %225 = vperm.xlu1 %2735, %v2968_v4  }
  0x3f   :  { %228 = vperm.xlu0 %2752, %v2992_v8  }
  0x41   :  { %231 = vperm.xlu1 %2735, %v2973_v5  }
  0x43   :  { %234 = vperm.xlu0 %2752, %v3007_v10  }
  0x45   :  { %2737 = vset.pattern.permute.xlu1 %v2912_v0 }
  0x46   :  { %348 = vperm.xlu1 %2737, %v2984_v7  }
  0x47   :  { %267 = vperm.xlu0 %2752, %v3014_v11  }
  0x4a   :  { %351 = vperm.xlu1 %2737, %v2956_v2  }
  0x4b   :  { %240 = vperm.xlu0 %2752, %v3032_v13  }
  0x4e   :  { %324 = vperm.xlu1 %2737, %v2992_v8  }
  0x4f   :  { %2760 = vset.pattern.permute.xlu0 %v2916_v14 }
  0x50   :  { %444 = vperm.xlu0 %2760, %v2984_v7  }
  0x52   :  { %2739 = vset.pattern.permute.xlu1 %v2916_v14 }
  0x53   :  { %441 = vperm.xlu1 %2739, %v2961_v3  }
  0x54   :  { %417 = vperm.xlu0 %2760, %v2968_v4  }
  0x57   :  { %447 = vperm.xlu1 %2739, %v2956_v2  }
  0x58   :  { %450 = vperm.xlu0 %2760, %v3046_v15  }
  0x5b   :  { %2740 = vset.pattern.permute.xlu1 %v4740_v1 }
  0x5c   :  { %426 = vperm.xlu0 %2760, %v3007_v10   ;;  %82 = vperm.xlu1 %2740, %v3046_v15  }
  0x60   :  { %459 = vperm.xlu0 %2760, %v3014_v11   ;;  %2741 = vset.pattern.permute.xlu1 %v2914_v6 }
  0x61   :  { %162 = vperm.xlu1 %2741, %v3046_v15  }
  0x64   :  { %432 = vperm.xlu0 %2760, %v3032_v13  }
  0x65   :  { %165 = vperm.xlu1 %2741, %v2999_v9  }
  0x68   :  { %2766 = vset.pattern.permute.xlu0 %v2914_v6 }
  0x69   :  { %156 = vperm.xlu0 %2766, %v2984_v7   ;;  %2742 = vset.pattern.permute.xlu1 %v2916_v14 }
  0x6a   :  { %420 = vperm.xlu1 %2742, %v2992_v8  }
  0x6d   :  { %132 = vperm.xlu0 %2766, %v2992_v8  }
  0x6e   :  { %423 = vperm.xlu1 %2742, %v2973_v5  }
  0x71   :  { %141 = vperm.xlu0 %2766, %v3067_v20  }
  0x72   :  { %2743 = vset.pattern.permute.xlu1 %v2917_v23 }
  0x73   :  { %540 = vperm.xlu1 %2743, %v2984_v7  }
  0x75   :  { %144 = vperm.xlu0 %2766, %v3032_v13  }
  0x77   :  { %543 = vperm.xlu1 %2743, %v2956_v2  }
  0x79   :  { %150 = vperm.xlu0 %2766, %v3076_v26  }
  0x7b   :  { %2744 = vset.pattern.permute.xlu1 %v4740_v1 }
  0x7c   :  { %61 = vperm.xlu1 %2744, %v3067_v20  }
  0x7d   :  { %2770 = vset.pattern.permute.xlu0 %v2917_v23 }
  0x7e   :  { %537 = vperm.xlu0 %2770, %v2961_v3  }
  0x80   :  { %2745 = vset.pattern.permute.xlu1 %v2914_v6 }
  0x81   :  { %138 = vperm.xlu1 %2745, %v3007_v10  }
  0x82   :  { %513 = vperm.xlu0 %2770, %v2968_v4  }
  0x85   :  { %2746 = vset.pattern.permute.xlu1 %v2915_v12 }
  0x86   :  { %549 = vperm.xlu0 %2770, %v2999_v9   ;;  %258 = vperm.xlu1 %2746, %v3046_v15  }
  0x8a   :  { %552 = vperm.xlu0 %2770, %v3093_v35   ;;  %261 = vperm.xlu1 %2746, %v2999_v9  }
  0x8e   :  { %531 = vperm.xlu0 %2770, %v3100_v36   ;;  %2747 = vset.pattern.permute.xlu1 %v2917_v23 }
  0x8f   :  { %516 = vperm.xlu1 %2747, %v2992_v8  }
  0x92   :  { %2773 = vset.pattern.permute.xlu0 %v2912_v0 }
  0x93   :  { %357 = vperm.xlu0 %2773, %v2999_v9   ;;  %519 = vperm.xlu1 %2747, %v2973_v5  }
  0x94   :  { %v3108_v37 = vpop.permute.xlu1 %79  ;;  %v346_v38 = vpop.permute.xlu0 %345 }
  0x95   :  { %vm376_vm2 = vcmp.eq.s32.totalorder %v346_v38, %v3145_v51  ;;  %vm106_vm14 = vcmp.eq.s32.totalorder %v3108_v37, %v3145_v51 }
  0x96   :  { %v392_v60 = vsel %vm376_vm2, 1, %v4740_v1 }
  0x97   :  { %2748 = vset.pattern.permute.xlu1 %v2915_v12  ;;  %360 = vperm.xlu0 %2773, %v3093_v35  }
  0x98   :  { %237 = vperm.xlu1 %2748, %v3067_v20   ;;  %v3113_v39 = vpop.permute.xlu0 %321 }
  0x99   :  { %v154_v40 = vpop.permute.xlu1 %153 }
  0x9a   :  { %vm184_vm1 = vcmp.eq.s32.totalorder %v154_v40, %v3145_v51 }
  0x9b   :  { %339 = vperm.xlu0 %2773, %v3100_v36   ;;  %v200_v56 = vsel %vm184_vm1, 1, %v4740_v1 }
  0x9c   :  { %2749 = vset.pattern.permute.xlu1 %v2912_v0  ;;  %v3117_v41 = vpop.permute.xlu0 %327 }
  0x9d   :  { %v3119_v42 = vpop.permute.xlu1 %159  ;;  %354 = vperm.xlu1 %2749, %v3046_v15  }
  0x9e   :  { %vm186_vm12 = vcmp.eq.s32.totalorder %v3119_v42, %v3145_v51 }
  0x9f   :  { %342 = vperm.xlu0 %2773, %v3076_v26  }
  0xa1   :  { %v74_v43 = vpop.permute.xlu0 %73  ;;  %330 = vperm.xlu1 %2749, %v3007_v10  }
  0xa2   :  { %v3124_v44 = vpop.permute.xlu1 %49  ;;  %vm104_vm0 = vcmp.eq.s32.totalorder %v74_v43, %v3145_v51 }
  0xa3   :  { %2777 = vset.pattern.permute.xlu0 %v2917_v23  ;;  %v120_v55 = vsel %vm104_vm0, 1, %v4740_v1 }
  0xa4   :  { %558 = vperm.xlu0 %2777, %v3129_v45   ;;  %v216_v58 = vadd.s32 %v200_v56, %v120_v55 }
  0xa5   :  { %333 = vperm.xlu1 %2749, %v3067_v20   ;;  %v3134_v46 = vpop.permute.xlu0 %76 }
  0xa6   :  { %v3136_v47 = vpop.permute.xlu1 %55  ;;  %vm105_vm8 = vcmp.eq.s32.totalorder %v3134_v46, %v3145_v51 }
  0xa7   :  { %v121_v55 = vsel %vm105_vm8, 1, %v4740_v1 }
  0xa9   :  { %2750 = vset.pattern.permute.xlu1 %v2916_v14  ;;  %v3139_v49 = vpop.permute.xlu0 %52 }
  0xaa   :  { %453 = vperm.xlu1 %2750, %v2999_v9   ;;  %vm97_vm9 = vcmp.eq.s32.totalorder %v3139_v49, %v3145_v51 }
  0xab   :  { %v3142_v50 = vpop.permute.xlu1 %129  ;;  %v113_v46 = vsel %vm97_vm9, 1, %v4740_v1 }
  0xad   :  { %v3147_v52 = vpop.permute.xlu0 %85 }
  0xae   :  { %2751 = vset.pattern.permute.xlu1 %v4740_v1  ;;  %vm108_vm5 = vcmp.eq.s32.totalorder %v3147_v52, %v3145_v51 }
  0xaf   :  { %88 = vperm.xlu1 %2751, %v3093_v35   ;;  %v3152_v53 = vpop.permute.xlu1 %135  ;;  %v124_v33 = vsel %vm108_vm5, 1, %v4740_v1 }
  0xb1   :  { %v3155_v54 = vpop.permute.xlu0 %58 }
  0xb3   :  { %2753 = vset.pattern.permute.xlu1 %v2914_v6 }
  0xb4   :  { %168 = vperm.xlu1 %2753, %v3093_v35   ;;  %v250_v57 = vpop.permute.xlu1 %249 }
  0xb5   :  { %vm280_vm3 = vcmp.eq.s32.totalorder %v250_v57, %v3145_v51  ;;  %v3163_v59 = vpop.permute.xlu0 %91 }
  0xb6   :  { %v296_v61 = vsel %vm280_vm3, 1, %v4740_v1 }
  0xb7   :  { %v312_v62 = vadd.s32 %v296_v61, %v216_v58  ;;  %v202_v61 = vsel %vm186_vm12, 1, %v4740_v1 }
  0xb8   :  { %171 = vperm.xlu1 %2753, %v3014_v11   ;;  %v3168_v63 = vpop.permute.xlu1 %255 }
  0xb9   :  { %v3170_v2 = vadd.s32 %v392_v60, %v312_v62  ;;  %vm282_vm0 = vcmp.eq.s32.totalorder %v3168_v63, %v3145_v51 }
  0xba   :  { %v3172_v3 = vpop.permute.xlu0 %252  ;;  %v298_v63 = vsel %vm282_vm0, 1, %v4740_v1 }
  0xbb   :  { %vm281_vm13 = vcmp.eq.s32.totalorder %v3172_v3, %v3145_v51 }
  0xbc   :  { %2754 = vset.pattern.permute.xlu1 %v2916_v14  ;;  %v3175_v4 = vpop.permute.xlu1 %225  ;;  %v297_v62 = vsel %vm281_vm13, 1, %v4740_v1  ;;  %vm96_vm13 = vcmp.eq.s32.totalorder %v3124_v44, %v3145_v51 }
  0xbd   :  { %429 = vperm.xlu1 %2754, %v3067_v20   ;;  %vm272_vm0 = vcmp.eq.s32.totalorder %v3175_v4, %v3145_v51 }
  0xbe   :  { %v3178_v5 = vpop.permute.xlu0 %228 }
  0xbf   :  { %vm273_vm11 = vcmp.eq.s32.totalorder %v3178_v5, %v3145_v51  ;;  %v122_v5 = vsel %vm106_vm14, 1, %v4740_v1  ;;  %vm176_vm14 = vcmp.eq.s32.totalorder %v3142_v50, %v3145_v51 }
  0xc0   :  { %v3180_v7 = vpop.permute.xlu1 %231  ;;  %v289_v42 = vsel %vm273_vm11, 1, %v4740_v1  ;;  %v192_v44 = vsel %vm176_vm14, 1, %v4740_v1 }
  0xc1   :  { %2755 = vset.pattern.permute.xlu1 %v2917_v23 }
  0xc2   :  { %546 = vperm.xlu1 %2755, %v3046_v15   ;;  %v3184_v8 = vpop.permute.xlu0 %234 }
  0xc3   :  { %vm275_vm12 = vcmp.eq.s32.totalorder %v3184_v8, %v3145_v51 }
  0xc4   :  { %v291_v8 = vsel %vm275_vm12, 1, %v4740_v1 }
  0xc5   :  { %v3186_v9 = vpop.permute.xlu1 %348 }
  0xc6   :  { %2756 = vset.pattern.permute.xlu1 %v4740_v1  ;;  %v3189_v16 = vpop.permute.xlu0 %267  ;;  %vm377_vm2 = vcmp.eq.s32.totalorder %v3186_v9, %v3145_v51 }
  0xc7   :  { %64 = vperm.xlu1 %2756, %v3032_v13  }
  0xc9   :  { %v3192_v17 = vpop.permute.xlu1 %351 }
  0xca   :  { %v3194_v18 = vpop.permute.xlu0 %240  ;;  %vm378_vm1 = vcmp.eq.s32.totalorder %v3192_v17, %v3145_v51 }
  0xcb   :  { %67 = vperm.xlu1 %2756, %v3100_v36  }
  0xcd   :  { %v3197_v19 = vpop.permute.xlu1 %324 }
  0xcf   :  { %v3199_v21 = vpop.permute.xlu0 %444  ;;  %2757 = vset.pattern.permute.xlu1 %v2914_v6 }
  0xd0   :  { %147 = vperm.xlu1 %2757, %v3100_v36  }
  0xd2   :  { %v3203_v15 = vpop.permute.xlu1 %441 }
  0xd3   :  { %v3205_v22 = vpop.permute.xlu0 %417 }
  0xd4   :  { %2758 = vset.pattern.permute.xlu1 %v2915_v12 }
  0xd5   :  { %264 = vperm.xlu1 %2758, %v3093_v35  }
  0xd6   :  { %v3209_v24 = vpop.permute.xlu1 %447 }
  0xd7   :  { %v3211_v25 = vpop.permute.xlu0 %450  ;;  %vm474_vm3 = vcmp.eq.s32.totalorder %v3209_v24, %v3145_v51 }
  0xd9   :  { %2759 = vset.pattern.permute.xlu1 %v2917_v23 }
  0xda   :  { %522 = vperm.xlu1 %2759, %v3007_v10  }
  0xdb   :  { %v83_v27 = vpop.permute.xlu1 %82  ;;  %v3215_v28 = vpop.permute.xlu0 %426 }
  0xdc   :  { %vm107_vm4 = vcmp.eq.s32.totalorder %v83_v27, %v3145_v51 }
  0xdd   :  { %v123_v31 = vsel %vm107_vm4, 1, %v4740_v1  ;;  %vm473_vm4 = vcmp.eq.s32.totalorder %v3199_v21, %v3145_v51 }
  0xde   :  { %525 = vperm.xlu1 %2759, %v3067_v20  }
  0xdf   :  { %v3219_v29 = vpop.permute.xlu0 %459 }
  0xe0   :  { %v163_v30 = vpop.permute.xlu1 %162 }
  0xe1   :  { %vm187_vm6 = vcmp.eq.s32.totalorder %v163_v30, %v3145_v51  ;;  %v218_v30 = vadd.s32 %v202_v61, %v122_v5 }
  0xe2   :  { %v203_v32 = vsel %vm187_vm6, 1, %v4740_v1  ;;  %2761 = vset.pattern.permute.xlu1 %v2915_v12 }
  0xe3   :  { %v3227_v10 = vadd.s32 %v203_v32, %v123_v31  ;;  %243 = vperm.xlu1 %2761, %v3100_v36   ;;  %v3230_v20 = vpop.permute.xlu0 %432  ;;  %v394_v32 = vsel %vm378_vm1, 1, %v4740_v1 }
  0xe4   :  { %v166_v34 = vpop.permute.xlu1 %165 }
  0xe5   :  { %vm188_vm7 = vcmp.eq.s32.totalorder %v166_v34, %v3145_v51 }
  0xe6   :  { %v204_v38 = vsel %vm188_vm7, 1, %v4740_v1  ;;  %vm472_vm7 = vcmp.eq.s32.totalorder %v3203_v15, %v3145_v51 }
  0xe7   :  { %v3235_v40 = vadd.s32 %v204_v38, %v124_v33  ;;  %2762 = vset.pattern.permute.xlu1 %v2912_v0  ;;  %v314_v33 = vadd.s32 %v298_v63, %v218_v30  ;;  %v393_v38 = vsel %vm377_vm2, 1, %v4740_v1  ;;  %vm368_vm2 = vcmp.eq.s32.totalorder %v3113_v39, %v3145_v51 }
  0xe8   :  { %v157_v43 = vpop.permute.xlu0 %156  ;;  %363 = vperm.xlu1 %2762, %v3014_v11  }
  0xe9   :  { %vm185_vm10 = vcmp.eq.s32.totalorder %v157_v43, %v3145_v51  ;;  %v3244_v52 = vpop.permute.xlu1 %420  ;;  %v410_v9 = vadd.s32 %v394_v32, %v314_v33 }
  0xea   :  { %v201_v56 = vsel %vm185_vm10, 1, %v4740_v1  ;;  %vm99_vm10 = vcmp.eq.s32.totalorder %v3155_v54, %v3145_v51  ;;  %v3317_v54 = vshrl.u32 %v46_v48, 7 }
  0xeb   :  { %v217_v58 = vadd.s32 %v201_v56, %v121_v55  ;;  %v489_v55 = vsel %vm473_vm4, 1, %v4740_v1  ;;  %vm98_vm4 = vcmp.eq.s32.totalorder %v3136_v47, %v3145_v51 }
  0xec   :  { %v133_v49 = vpop.permute.xlu0 %132  ;;  %336 = vperm.xlu1 %2762, %v3032_v13   ;;  %vm650_vm1 = vcmp.lt.s32.totalorder %v3317_v54, 7 }
  0xed   :  { %vm177_vm15 = vcmp.eq.s32.totalorder %v133_v49, %v3145_v51  ;;  %v3259_v57 = vpop.permute.xlu1 %423  ;;  %v313_v31 = vadd.s32 %v297_v62, %v217_v58 }
  0xee   :  { %v193_v60 = vsel %vm177_vm15, 1, %v4740_v1 }
  0xef   :  { %v209_v3 = vadd.s32 %v193_v60, %v113_v46  ;;  %v409_v43 = vadd.s32 %v393_v38, %v313_v31  ;;  %v488_v60 = vsel %vm472_vm7, 1, %v4740_v1  ;;  %v115_v31 = vsel %vm99_vm10, 1, %v4740_v1 }
  0xf0   :  { %2763 = vset.pattern.permute.xlu1 %v2916_v14  ;;  %v142_v37 = vpop.permute.xlu0 %141  ;;  %v504_v5 = vadd.s32 %v488_v60, %v3170_v2  ;;  %vm464_vm7 = vcmp.eq.s32.totalorder %v3205_v22, %v3145_v51 }
  0xf1   :  { %v3272_v27 = vadd.s32 %v289_v42, %v209_v3  ;;  %456 = vperm.xlu1 %2763, %v3093_v35   ;;  %v490_v35 = vsel %vm474_vm3, 1, %v4740_v1  ;;  %vm180_vm8 = vcmp.eq.s32.totalorder %v142_v37, %v3145_v51  ;;  %v505_v42 = vadd.s32 %v489_v55, %v409_v43 }
  0xf2   :  { %v541_v17 = vpop.permute.xlu1 %540  ;;  %v506_v21 = vadd.s32 %v490_v35, %v410_v9  ;;  %v196_v61 = vsel %vm180_vm8, 1, %v4740_v1  ;;  %v112_v9 = vsel %vm96_vm13, 1, %v4740_v1  ;;  %vm178_vm3 = vcmp.eq.s32.totalorder %v3152_v53, %v3145_v51 }
  0xf3   :  { %vm569_vm5 = vcmp.eq.s32.totalorder %v541_v17, %v3145_v51  ;;  %v208_v53 = vadd.s32 %v192_v44, %v112_v9  ;;  %vm370_vm8 = vcmp.eq.s32.totalorder %v3117_v41, %v3145_v51 }
  0xf4   :  { %v3282_v34 = vpop.permute.xlu0 %144  ;;  %v585_v49 = vsel %vm569_vm5, 1, %v4740_v1  ;;  %vm274_vm5 = vcmp.eq.s32.totalorder %v3180_v7, %v3145_v51 }
  0xf5   :  { %2764 = vset.pattern.permute.xlu1 %v4740_v1  ;;  %v601_v62 = vadd.s32 %v585_v49, %v505_v42  ;;  %v290_v39 = vsel %vm274_vm5, 1, %v4740_v1 }
  0xf6   :  { %94 = vperm.xlu1 %2764, %v3129_v45   ;;  %v544_v24 = vpop.permute.xlu1 %543 }
  0xf7   :  { %vm570_vm6 = vcmp.eq.s32.totalorder %v544_v24, %v3145_v51  ;;  %v3320_v17 = vcvt.s32.f32 %v601_v62  ;;  %v288_v24 = vsel %vm272_vm0, 1, %v4740_v1 }
  0xf8   :  { %v586_v56 = vsel %vm570_vm6, 1, %v4740_v1  ;;  %v3295_v46 = vpop.permute.xlu0 %150  ;;  %vm369_vm6 = vcmp.eq.s32.totalorder %v3197_v19, %v3145_v51  ;;  %v304_v60 = vadd.s32 %v288_v24, %v208_v53  ;;  %v114_v19 = vsel %vm98_vm4, 1, %v4740_v1 }
  0xf9   :  { %v602_v58 = vadd.s32 %v586_v56, %v506_v21  ;;  %v641_v35 = vrot.slane %v3320_v17, 1  ;;  %v194_v56 = vsel %vm178_vm3, 1, %v4740_v1 }
  0xfa   :  { %2765 = vset.pattern.permute.xlu1 %v2914_v6  ;;  %v210_v22 = vadd.s32 %v194_v56, %v114_v19  ;;  %v2797_v19 = vld [vmem:[#allocation2 + $0xc8] sm:$0xff]  }
  0xfb   :  { %174 = vperm.xlu1 %2765, %v3129_v45   ;;  %v62_v15 = vpop.permute.xlu1 %61  ;;  %v3307_v63 = vcvt.s32.f32 %v602_v58  ;;  %v384_v58 = vsel %vm368_vm2, 1, %v4740_v1  ;;  %vm467_vm2 = vcmp.eq.s32.totalorder %v3215_v28, %v3145_v51 }
  0xfc   :  { %vm100_vm9 = vcmp.eq.s32.totalorder %v62_v15, %v3145_v51  ;;  %v480_v15 = vsel %vm464_vm7, 1, %v4740_v1  ;;  %v306_v62 = vadd.s32 %v290_v39, %v210_v22  ;;  %v400_v47 = vadd.s32 %v384_v58, %v304_v60  ;;  %v2798_v22 = vld [vmem:[#allocation2 + $0x88] sm:$0xff]  }
  0xfd   :  { %v116_v3 = vsel %vm100_vm9, 1, %v4740_v1  ;;  %v538_v37 = vpop.permute.xlu0 %537  ;;  %v642_v38 = vrot.slane %v3307_v63, 1  ;;  %vm465_vm9 = vcmp.eq.s32.totalorder %v3244_v52, %v3145_v51 }
  0xfe   :  { %v3309_v6 = vadd.s32 %v196_v61, %v116_v3  ;;  %vm568_vm11 = vcmp.eq.s32.totalorder %v538_v37, %v3145_v51  ;;  %v385_v61 = vsel %vm369_vm6, 1, %v4740_v1  ;;  %v386_v3 = vsel %vm370_vm8, 1, %v4740_v1 }
  0xff   :  { %v584_v30 = vsel %vm568_vm11, 1, %v4740_v1  ;;  %2767 = vset.pattern.permute.xlu1 %v2916_v14  ;;  %v3357_v55 = vsel %vm650_vm1, %v641_v35, %v642_v38  ;;  %v401_v41 = vadd.s32 %v385_v61, %v3272_v27  ;;  %vm466_vm11 = vcmp.eq.s32.totalorder %v3259_v57, %v3145_v51 }
 0x100   :  { %v600_v2 = vadd.s32 %v584_v30, %v504_v5  ;;  %435 = vperm.xlu1 %2767, %v3100_v36   ;;  %v139_v32 = vpop.permute.xlu1 %138  ;;  %4790 = vst [vmem:[#allocation8_spill] sm:$0xff] %v3357_v55  ;;  %v481_v37 = vsel %vm465_vm9, 1, %v4740_v1  ;;  %v496_v30 = vadd.s32 %v480_v15, %v400_v47  ;;  %v482_v27 = vsel %vm466_vm11, 1, %v4740_v1  ;;  %v2799_v47 = vld [vmem:[#allocation2 + $0x140] sm:$0xff]  }
 0x101   :  { %vm179_vm15 = vcmp.eq.s32.totalorder %v139_v32, %v3145_v51  ;;  %v514_v49 = vpop.permute.xlu0 %513  ;;  %v402_v57 = vadd.s32 %v386_v3, %v306_v62  ;;  %2513 = vmatprep.subr.bf16.mxu0 %v2799_v47  ;;  %v2821_v47 = vld [vmem:[#allocation2 + $0xf8] sm:$0xff]   ;;  %vm110_vm8 = vcmp.eq.s32.totalorder %v3163_v59, %v3145_v51  ;;  %vm286_vm9 = vcmp.eq.s32.totalorder %v3189_v16, %v3145_v51 }
 0x102   :  { %v3329_v48 = vcvt.s32.f32 %v600_v2  ;;  %v195_v33 = vsel %vm179_vm15, 1, %v4740_v1  ;;  %vm560_vm10 = vcmp.eq.s32.totalorder %v514_v49, %v3145_v51  ;;  %v2795_v49 = vld [vmem:[#allocation2 + $0xc0] sm:$0xff]   ;;  %vm475_vm15 = vcmp.eq.s32.totalorder %v3211_v25, %v3145_v51 }
 0x103   :  { %v211_v36 = vadd.s32 %v195_v33, %v115_v31  ;;  %v576_v5 = vsel %vm560_vm10, 1, %v4740_v1  ;;  %v497_v31 = vadd.s32 %v481_v37, %v401_v41  ;;  %2449 = vmatprep.subr.bf16.mxu1 %v2795_v49  ;;  %v491_v15 = vsel %vm475_vm15, 1, %v4740_v1  ;;  %v2801_v37 = vld [vmem:[#allocation2 + $0xd0] sm:$0xff]   ;;  %v2811_v49 = vld [vmem:[#allocation2 + $0x158] sm:$0xff]  }
 0x104   :  { %2768 = vset.pattern.permute.xlu1 %v2917_v23  ;;  %v4723_v50 = vrot.slane %v3329_v48, 1  ;;  %v628_v42 = vpack.c.bf16 %v3320_v17, %v3329_v48  ;;  %v592_v32 = vadd.s32 %v576_v5, %v496_v30  ;;  %v302_v59 = vsel %vm286_vm9, 1, %v4740_v1 }
 0x105   :  { %555 = vperm.xlu1 %2768, %v3014_v11   ;;  %v3346_v4 = vpop.permute.xlu1 %258  ;;  %v3348_v43 = vadd.s32 %v291_v8, %v211_v36  ;;  %v498_v36 = vadd.s32 %v482_v27, %v402_v57  ;;  %v2803_v27 = vld [vmem:[#allocation2 + $0x148] sm:$0xff]   ;;  %vm277_vm15 = vcmp.eq.s32.totalorder %v3194_v18, %v3145_v51 }
 0x106   :  { %v3363_v11 = vsel %vm650_vm1, %v4723_v50, %v641_v35  ;;  %v3413_v9 = vcvt.s32.f32 %v592_v32  ;;  %vm283_vm14 = vcmp.eq.s32.totalorder %v3346_v4, %v3145_v51  ;;  %v2804_v57 = vld [vmem:[#allocation2 + $0x108] sm:$0xff]   ;;  %v2805_v32 = vld [vmem:[#allocation2 + $0xd8] sm:$0xff]  }
 0x107   :  { %4791 = vst [vmem:[#allocation9_spill] sm:$0xff] %v3363_v11  ;;  %v671_v21 = vpack.c.bf16 %v3357_v55, %v3363_v11  ;;  %v299_v60 = vsel %vm283_vm14, 1, %v4740_v1  ;;  %vm181_vm14 = vcmp.eq.s32.totalorder %v3282_v34, %v3145_v51 }
 0x108   :  { %v315_v25 = vadd.s32 %v299_v60, %v3227_v10  ;;  %v3453_v10 = vpop.permute.xlu0 %549  ;;  %v2812_v60 = vld [vmem:[#allocation2 + $0x118] sm:$0xff]  }
 0x109   :  { %2769 = vset.pattern.permute.xlu1 %v4740_v1  ;;  %1646 = vmatprep.mubr.bf16.mxu1 %v671_v21  ;;  %v3381_v7 = vpop.permute.xlu1 %261 }
 0x10a   :  { %70 = vperm.xlu1 %2769, %v3076_v26   ;;  %1647 = vmatmul.mubr.bf16.vlgmr.msra.gmra.mrb[0].mxu1 %v628_v42  ;;  %v2796_v42 = vld [vmem:[#allocation2 + $0x80] sm:$0xff]   ;;  %vm284_vm4 = vcmp.eq.s32.totalorder %v3381_v7, %v3145_v51 }
 0x10b   :  { %2450 = vmatpush3.bf16.msra.mxu1 %v2796_v42 }
 0x10c   :  { %2451 = vmatprep.subr.bf16.mxu1 %v2797_v19  ;;  %v2813_v19 = vld [vmem:[#allocation2 + $0xe8] sm:$0xff]  }
 0x10e   :  { %2771 = vset.pattern.permute.xlu1 %v2915_v12  ;;  %v517_v52 = vpop.permute.xlu1 %516 }
 0x10f   :  { %vm561_vm12 = vcmp.eq.s32.totalorder %v517_v52, %v3145_v51  ;;  %270 = vperm.xlu1 %2771, %v3129_v45   ;;  %2452 = vmatpush3.bf16.msra.mxu1 %v2798_v22  ;;  %v2802_v52 = vld [vmem:[#allocation2 + $0x90] sm:$0xff]   ;;  %v2815_v22 = vld [vmem:[#allocation2 + $0x160] sm:$0xff]  }
 0x110   :  { %v577_v2 = vsel %vm561_vm12, 1, %v4740_v1  ;;  %2453 = vmatprep.subr.bf16.mxu1 %v2801_v37  ;;  %v300_v37 = vsel %vm284_vm4, 1, %v4740_v1  ;;  %vm572_vm12 = vcmp.eq.s32.totalorder %v3453_v10, %v3145_v51 }
 0x111   :  { %v593_v8 = vadd.s32 %v577_v2, %v497_v31  ;;  %v483_v31 = vsel %vm467_vm2, 1, %v4740_v1 }
 0x112   :  { %v520_v33 = vpop.permute.xlu1 %519 }
 0x113   :  { %v3407_v44 = vcvt.s32.f32 %v593_v8  ;;  %vm562_vm13 = vcmp.eq.s32.totalorder %v520_v33, %v3145_v51  ;;  %2772 = vset.pattern.permute.xlu1 %v2917_v23  ;;  %2454 = vmatpush3.bf16.msra.mxu1 %v2802_v52  ;;  %v2806_v33 = vld [vmem:[#allocation2 + $0x98] sm:$0xff]  }
 0x114   :  { %v578_v35 = vsel %vm562_vm13, 1, %v4740_v1  ;;  %528 = vperm.xlu1 %2772, %v3032_v13   ;;  %v4725_v13 = vrot.slane %v3413_v9, 1  ;;  %2455 = vmatprep.subr.bf16.mxu1 %v2805_v32  ;;  %v126_v32 = vsel %vm110_vm8, 1, %v4740_v1  ;;  %vm814_vm8 = vcmp.lt.s32.totalorder %v3317_v54, 3 }
 0x115   :  { %v594_v24 = vadd.s32 %v578_v35, %v498_v36  ;;  %v633_v56 = vrot.slane %v3407_v44, 1  ;;  %v624_v41 = vpack.c.bf16 %v3407_v44, %v3413_v9  ;;  %v3465_v36 = vpop.permute.xlu0 %552 }
 0x117   :  { %v3417_v53 = vcvt.s32.f32 %v594_v24  ;;  %v3419_v21 = vpop.permute.xlu1 %237  ;;  %v2807_v24 = vld [vmem:[#allocation2 + $0x150] sm:$0xff]   ;;  %2456 = vmatpush3.bf16.msra.mxu1 %v2806_v33 }
 0x118   :  { %2774 = vset.pattern.permute.xlu1 %v2915_v12  ;;  %v3439_v12 = vsel %vm650_vm1, %v4725_v13, %v633_v56  ;;  %vm276_vm2 = vcmp.eq.s32.totalorder %v3419_v21, %v3145_v51 }
 0x119   :  { %246 = vperm.xlu1 %2774, %v3076_v26   ;;  %v634_v58 = vrot.slane %v3417_v53, 1  ;;  %4793 = vst [vmem:[#allocation11_spill] sm:$0xff] %v3439_v12  ;;  %v3470_v42 = vpop.permute.xlu0 %531 }
 0x11b   :  { %v3433_v4 = vsel %vm650_vm1, %v633_v56, %v634_v58 }
 0x11c   :  { %4792 = vst [vmem:[#allocation10_spill] sm:$0xff] %v3433_v4  ;;  %v355_v39 = vpop.permute.xlu1 %354  ;;  %v667_v61 = vpack.c.bf16 %v3433_v4, %v3439_v12 }
 0x11d   :  { %vm379_vm0 = vcmp.eq.s32.totalorder %v355_v39, %v3145_v51  ;;  %2775 = vset.pattern.permute.xlu1 %v2912_v0  ;;  %v2800_v0 = vld [vmem:[#allocation2 + $0x100] sm:$0xff]   ;;  %v2814_v39 = vld [vmem:[#allocation2 + $0xa8] sm:$0xff]  }
 0x11e   :  { %v395_v62 = vsel %vm379_vm0, 1, %v4740_v1  ;;  %366 = vperm.xlu1 %2775, %v3129_v45   ;;  %1614 = vmatprep.mubr.bf16.mxu0 %v667_v61 }
 0x11f   :  { %v411_v3 = vadd.s32 %v395_v62, %v315_v25  ;;  %1615 = vmatmul.mubr.bf16.vlgmr.msra.gmra.mrb[0].mxu0 %v624_v41  ;;  %v2816_v25 = vld [vmem:[#allocation2 + $0x120] sm:$0xff]   ;;  %v2817_v41 = vld [vmem:[#allocation2 + $0xf0] sm:$0xff]   ;;  %v358_v62 = vpop.permute.xlu0 %357 }
 0x120   :  { %v331_v5 = vpop.permute.xlu1 %330  ;;  %2514 = vmatpush3.bf16.msra.mxu0 %v2800_v0  ;;  %v2822_v0 = vld [vmem:[#allocation2 + $0xb8] sm:$0xff]   ;;  %vm380_vm6 = vcmp.eq.s32.totalorder %v358_v62, %v3145_v51 }
 0x121   :  { %vm371_vm3 = vcmp.eq.s32.totalorder %v331_v5, %v3145_v51  ;;  %v3456_v30 = vadd.s32 %v491_v15, %v411_v3  ;;  %2515 = vmatprep.subr.bf16.mxu0 %v2803_v27  ;;  %v2818_v15 = vld [vmem:[#allocation2 + $0xb0] sm:$0xff]  }
 0x122   :  { %v387_v28 = vsel %vm371_vm3, 1, %v4740_v1  ;;  %2776 = vset.pattern.permute.xlu1 %v2916_v14  ;;  %v2808_v14 = vld [vmem:[#allocation2 + $0x110] sm:$0xff]  }
 0x123   :  { %v403_v2 = vadd.s32 %v387_v28, %v3348_v43  ;;  %462 = vperm.xlu1 %2776, %v3129_v45   ;;  %v2809_v43 = vld [vmem:[#allocation2 + $0xe0] sm:$0xff]   ;;  %v2823_v27 = vld [vmem:[#allocation2 + $0x170] sm:$0xff]  }
 0x124   :  { %v3463_v8 = vpop.permute.xlu1 %333  ;;  %2516 = vmatpush3.bf16.msra.mxu0 %v2804_v57  ;;  %v2810_v45 = vld [vmem:[#allocation2 + $0xa0] sm:$0xff]   ;;  %2457 = vmatprep.subr.bf16.mxu1 %v2809_v43  ;;  %v2824_v57 = vld [vmem:[#allocation2 + $0x130] sm:$0xff]   ;;  %v2825_v43 = vld [vmem:[#allocation2 + $0x178] sm:$0xff]  }
 0x125   :  { %v3467_v35 = vadd.s32 %v483_v31, %v403_v2  ;;  %2517 = vmatprep.subr.bf16.mxu0 %v2807_v24  ;;  %2458 = vmatpush3.bf16.msra.mxu1 %v2810_v45  ;;  %v396_v31 = vsel %vm380_vm6, 1, %v4740_v1  ;;  %v316_v2 = vadd.s32 %v300_v37, %v3235_v40  ;;  %v2826_v40 = vld [vmem:[#allocation2 + $0x138] sm:$0xff]   ;;  %v2827_v45 = vld [vmem:[#allocation2 + $0x1c0] sm:$0xff]   ;;  %vm372_vm3 = vcmp.eq.s32.totalorder %v3463_v8, %v3145_v51 }
 0x126   :  { %2459 = vmatprep.subr.bf16.mxu1 %v2813_v19  ;;  %vm732_vm6 = vcmp.lt.s32.totalorder %v3317_v54, 5 }
 0x127   :  { %438 = vperm.xlu1 %2776, %v3076_v26   ;;  %v412_v24 = vadd.s32 %v396_v31, %v316_v2  ;;  %v388_v2 = vsel %vm372_vm3, 1, %v4740_v1 }
 0x128   :  { %2518 = vmatpush3.bf16.msra.mxu0 %v2808_v14 }
 0x129   :  { %v454_v56 = vpop.permute.xlu1 %453  ;;  %2519 = vmatprep.subr.bf16.mxu0 %v2811_v49  ;;  %2460 = vmatpush3.bf16.msra.mxu1 %v2814_v39  ;;  %v588_v39 = vsel %vm572_vm12, 1, %v4740_v1  ;;  %vm478_vm12 = vcmp.eq.s32.totalorder %v3219_v29, %v3145_v51 }
 0x12a   :  { %2461 = vmatprep.subr.bf16.mxu1 %v2817_v41  ;;  %vm476_vm10 = vcmp.eq.s32.totalorder %v454_v56, %v3145_v51  ;;  %v2829_v56 = vld [vmem:[#allocation2 + $0x240] sm:$0xff]  }
 0x12b   :  { %2778 = vset.pattern.permute.xlu1 %v2917_v23  ;;  %v2819_v23 = vld [vmem:[#allocation2 + $0x168] sm:$0xff]   ;;  %v492_v16 = vsel %vm476_vm10, 1, %v4740_v1  ;;  %vm773_vm10 = vcmp.lt.s32.totalorder %v3317_v54, 4 }
 0x12c   :  { %534 = vperm.xlu1 %2778, %v3076_v26   ;;  %2520 = vmatpush3.bf16.msra.mxu0 %v2812_v60  ;;  %v2820_v26 = vld [vmem:[#allocation2 + $0x128] sm:$0xff]   ;;  %v508_v49 = vadd.s32 %v492_v16, %v412_v24 }
 0x12d   :  { %2521 = vmatprep.subr.bf16.mxu0 %v2815_v22  ;;  %2462 = vmatpush3.bf16.msra.mxu1 %v2818_v15  ;;  %v197_v15 = vsel %vm181_vm14, 1, %v4740_v1  ;;  %vm855_vm14 = vcmp.lt.s32.totalorder %v3317_v54, 2 }
 0x12e   :  { %v89_v61 = vpop.permute.xlu1 %88  ;;  %2463 = vmatprep.subr.bf16.mxu1 %v2821_v47 }
 0x12f   :  { %vm109_vm5 = vcmp.eq.s32.totalorder %v89_v61, %v3145_v51  ;;  %v604_v61 = vadd.s32 %v588_v39, %v508_v49 }
 0x130   :  { %2522 = vmatpush3.bf16.msra.mxu0 %v2816_v25  ;;  %v125_v5 = vsel %vm109_vm5, 1, %v4740_v1 }
 0x131   :  { %2523 = vmatprep.subr.bf16.mxu0 %v2819_v23  ;;  %2464 = vmatpush3.bf16.msra.mxu1 %v2822_v0  ;;  %v3505_v25 = vcvt.s32.f32 %v604_v61  ;;  %v293_v0 = vsel %vm277_vm15, 1, %v4740_v1 }
 0x132   :  { %2577 = vmatprep.subr.bf16.mxu1 %v2827_v45 }
 0x133   :  { %v169_v3 = vpop.permute.xlu1 %168  ;;  %v644_v47 = vrot.slane %v3505_v25, 1 }
 0x134   :  { %vm189_vm7 = vcmp.eq.s32.totalorder %v169_v3, %v3145_v51  ;;  %2524 = vmatpush3.bf16.msra.mxu0 %v2820_v26 }
 0x135   :  { %v205_v7 = vsel %vm189_vm7, 1, %v4740_v1  ;;  %2525 = vmatprep.subr.bf16.mxu0 %v2823_v27  ;;  %vm691_vm7 = vcmp.lt.s32.totalorder %v3317_v54, 6 }
 0x136   :  { %v3487_v52 = vadd.s32 %v205_v7, %v125_v5 }
 0x137   :  { %v172_v28 = vpop.permute.xlu1 %171 }
 0x138   :  { %vm190_vm11 = vcmp.eq.s32.totalorder %v172_v28, %v3145_v51  ;;  %2526 = vmatpush3.bf16.msra.mxu0 %v2824_v57 }
 0x139   :  { %v206_v33 = vsel %vm190_vm11, 1, %v4740_v1  ;;  %2527 = vmatprep.subr.bf16.mxu0 %v2825_v43  ;;  %v4730_v43 = vrot.slane %v3417_v53, 3  ;;  %vm896_vm11 = vcmp.lt.s32.totalorder %v3317_v54, 1 }
 0x13a   :  { %v222_v14 = vadd.s32 %v206_v33, %v126_v32 }
 0x13c   :  { %v430_v60 = vpop.permute.xlu1 %429  ;;  %v3498_v19 = vadd.s32 %v302_v59, %v222_v14  ;;  %2528 = vmatpush3.bf16.msra.mxu0 %v2826_v40 }
 0x13d   :  { %2641 = vmatprep.subr.bf16.mxu0 %v2829_v56  ;;  %vm468_vm4 = vcmp.eq.s32.totalorder %v430_v60, %v3145_v51  ;;  %v4726_v56 = vrot.slane %v3417_v53, 5  ;;  %v4724_v60 = vrot.slane %v3417_v53, 4 }
 0x13e   :  { %v484_v59 = vsel %vm468_vm4, 1, %v4740_v1  ;;  %vm573_vm4 = vcmp.eq.s32.totalorder %v3465_v36, %v3145_v51 }
 0x141   :  { %v547_v22 = vpop.permute.xlu1 %546 }
 0x142   :  { %vm571_vm13 = vcmp.eq.s32.totalorder %v547_v22, %v3145_v51  ;;  %v4728_v22 = vrot.slane %v3417_v53, 7 }
 0x143   :  { %v587_v10 = vsel %vm571_vm13, 1, %v4740_v1 }
 0x144   :  { %v603_v41 = vadd.s32 %v587_v10, %v3456_v30 }
 0x146   :  { %v3509_v62 = vcvt.s32.f32 %v603_v41  ;;  %v65_v23 = vpop.permute.xlu1 %64 }
 0x147   :  { %vm101_vm0 = vcmp.eq.s32.totalorder %v65_v23, %v3145_v51  ;;  %v4727_v23 = vrot.slane %v3417_v53, 6 }
 0x148   :  { %v117_v26 = vsel %vm101_vm0, 1, %v4740_v1  ;;  %v643_v34 = vrot.slane %v3509_v62, 1  ;;  %v629_v31 = vpack.c.bf16 %v3509_v62, %v3307_v63  ;;  %vm469_vm0 = vcmp.eq.s32.totalorder %v3230_v20, %v3145_v51 }
 0x149   :  { %v213_v3 = vadd.s32 %v197_v15, %v117_v26 }
 0x14a   :  { %v3518_v30 = vpop.permute.xlu1 %67  ;;  %v3524_v37 = vsel %vm650_vm1, %v643_v34, %v644_v47  ;;  %v3530_v18 = vsel %vm650_vm1, %v642_v38, %v643_v34  ;;  %v292_v38 = vsel %vm276_vm2, 1, %v4740_v1 }
 0x14b   :  { %4794 = vst [vmem:[#allocation12_spill] sm:$0xff] %v3524_v37  ;;  %4795 = vst [vmem:[#allocation13_spill] sm:$0xff] %v3530_v18  ;;  %v672_v5 = vpack.c.bf16 %v3524_v37, %v3530_v18  ;;  %v3534_v7 = vadd.s32 %v293_v0, %v213_v3  ;;  %v308_v32 = vadd.s32 %v292_v38, %v3309_v6 }
 0x14d   :  { %1654 = vmatprep.mubr.bf16.mxu1 %v672_v5  ;;  %v404_v16 = vadd.s32 %v388_v2, %v308_v32 }
 0x14e   :  { %1655 = vmatmul.mubr.bf16.gmra.mrb[4].mxu1 %v629_v31 }
 0x14f   :  { %v3538_v28 = vpop.permute.xlu1 %147  ;;  %v500_v8 = vadd.s32 %v484_v59, %v404_v16 }
 0x154   :  { %v3542_v27 = vpop.permute.xlu1 %264 }
 0x155   :  { %vm285_vm13 = vcmp.eq.s32.totalorder %v3542_v27, %v3145_v51 }
 0x156   :  { %v301_v13 = vsel %vm285_vm13, 1, %v4740_v1 }
 0x157   :  { %v317_v20 = vadd.s32 %v301_v13, %v3487_v52  ;;  %v589_v13 = vsel %vm573_vm4, 1, %v4740_v1 }
 0x159   :  { %v523_v57 = vpop.permute.xlu1 %522 }
 0x15a   :  { %vm563_vm5 = vcmp.eq.s32.totalorder %v523_v57, %v3145_v51 }
 0x15b   :  { %v579_v21 = vsel %vm563_vm5, 1, %v4740_v1 }
 0x15c   :  { %v595_v33 = vadd.s32 %v579_v21, %v3467_v35  ;;  %v4729_v35 = vrot.slane %v3417_v53, 2 }
 0x15d   :  { %v526_v24 = vpop.permute.xlu1 %525 }
 0x15e   :  { %v3557_v14 = vcvt.s32.f32 %v595_v33  ;;  %vm564_vm9 = vcmp.eq.s32.totalorder %v526_v24, %v3145_v51 }
 0x15f   :  { %v580_v6 = vsel %vm564_vm9, 1, %v4740_v1  ;;  %vm182_vm9 = vcmp.eq.s32.totalorder %v3538_v28, %v3145_v51 }
 0x160   :  { %4796 = vst [vmem:[#allocation14_spill] sm:$0xff] %v3557_v14  ;;  %v596_v40 = vadd.s32 %v580_v6, %v500_v8  ;;  %v635_v45 = vrot.slane %v3557_v14, 1  ;;  %v719_v49 = vrot.slane %v3557_v14, 3  ;;  %v678_v39 = vrot.slane %v3557_v14, 2 }
 0x161   :  { %v801_v61 = vrot.slane %v3557_v14, 5  ;;  %v625_v15 = vpack.c.bf16 %v3557_v14, %v3417_v53  ;;  %v760_v3 = vrot.slane %v3557_v14, 4  ;;  %v883_v0 = vrot.slane %v3557_v14, 7 }
 0x162   :  { %v3576_v10 = vcvt.s32.f32 %v596_v40  ;;  %v3578_v41 = vpop.permute.xlu1 %243  ;;  %v3587_v26 = vsel %vm650_vm1, %v634_v58, %v635_v45  ;;  %v3593_v34 = vsel %vm732_vm6, %v4730_v43, %v719_v49  ;;  %v842_v58 = vrot.slane %v3557_v14, 6 }
 0x163   :  { %4798 = vst [vmem:[#allocation16_spill] sm:$0xff] %v3587_v26  ;;  %v3606_v2 = vsel %vm691_vm7, %v4729_v35, %v678_v39  ;;  %v3613_v32 = vsel %vm814_vm8, %v4726_v56, %v801_v61  ;;  %vm278_vm13 = vcmp.eq.s32.totalorder %v3578_v41, %v3145_v51  ;;  %v4736_v41 = vrot.slane %v3505_v25, 3 }
 0x164   :  { %4797 = vst [vmem:[#allocation15_spill] sm:$0xff] %v3576_v10  ;;  %v4738_v5 = vrot.slane %v3576_v10, 1  ;;  %v4737_v31 = vrot.slane %v3576_v10, 3  ;;  %v4735_v38 = vrot.slane %v3576_v10, 2  ;;  %v4734_v57 = vrot.slane %v3576_v10, 5 }
 0x165   :  { %v4733_v59 = vrot.slane %v3576_v10, 4  ;;  %v4732_v24 = vrot.slane %v3576_v10, 7  ;;  %v4731_v40 = vrot.slane %v3576_v10, 6  ;;  %v3705_v29 = vsel %vm855_vm14, %v4727_v23, %v842_v58 }
 0x166   :  { %v3620_v21 = vsel %vm650_vm1, %v635_v45, %v4738_v5  ;;  %v3626_v16 = vsel %vm732_vm6, %v719_v49, %v4737_v31  ;;  %v3632_v33 = vsel %vm691_vm7, %v678_v39, %v4735_v38  ;;  %v3645_v49 = vsel %vm773_vm10, %v4724_v60, %v760_v3  ;;  %v361_v39 = vpop.permute.xlu0 %360  ;;  %4803 = vst [vmem:[#allocation21_spill] sm:$0xff] %v3705_v29 }
 0x167   :  { %4799 = vst [vmem:[#allocation17_spill] sm:$0xff] %v3620_v21  ;;  %v364_v8 = vpop.permute.xlu1 %363  ;;  %v668_v6 = vpack.c.bf16 %v3620_v21, %v3587_v26  ;;  %v3652_v50 = vsel %vm814_vm8, %v801_v61, %v4734_v57  ;;  %v3658_v45 = vsel %vm773_vm10, %v760_v3, %v4733_v59  ;;  %v3664_v60 = vsel %vm896_vm11, %v883_v0, %v4732_v24 }
 0x168   :  { %vm382_vm15 = vcmp.eq.s32.totalorder %v364_v8, %v3145_v51  ;;  %4800 = vst [vmem:[#allocation18_spill] sm:$0xff] %v3664_v60  ;;  %v3675_v3 = vsel %vm896_vm11, %v4728_v22, %v883_v0  ;;  %v494_v61 = vsel %vm478_vm12, 1, %v4740_v1  ;;  %vm381_vm2 = vcmp.eq.s32.totalorder %v361_v39, %v3145_v51 }
 0x169   :  { %v398_v8 = vsel %vm382_vm15, 1, %v4740_v1  ;;  %1622 = vmatprep.mubr.bf16.mxu0 %v668_v6  ;;  %4801 = vst [vmem:[#allocation19_spill] sm:$0xff] %v3675_v3  ;;  %v3699_v0 = vsel %vm855_vm14, %v842_v58, %v4731_v40  ;;  %vm102_vm12 = vcmp.eq.s32.totalorder %v3518_v30, %v3145_v51  ;;  %vm566_vm15 = vcmp.eq.s32.totalorder %v3470_v42, %v3145_v51 }
 0x16a   :  { %v414_v56 = vadd.s32 %v398_v8, %v3498_v19  ;;  %1623 = vmatmul.mubr.bf16.gmra.mrb[4].mxu0 %v625_v15  ;;  %4802 = vst [vmem:[#allocation20_spill] sm:$0xff] %v3699_v0  ;;  %v4742_v43 = vrot.slane %v3505_v25, 5  ;;  %v4820_v37 = vrot.slane %v3576_v10, 3  ;;  %v4829_v21 = vrot.slane %v3576_v10, 7 }
 0x16b   :  { %v337_v27 = vpop.permute.xlu1 %336  ;;  %v4838_v0 = vrot.slane %v3417_v53, 5  ;;  %v4860_v3 = vrot.slane %v3329_v48, 3 }
 0x16c   :  { %vm373_vm3 = vcmp.eq.s32.totalorder %v337_v27, %v3145_v51  ;;  %v510_v15 = vadd.s32 %v494_v61, %v414_v56  ;;  %v397_v56 = vsel %vm381_vm2, 1, %v4740_v1  ;;  %v485_v27 = vsel %vm469_vm0, 1, %v4740_v1 }
 0x16d   :  { %v389_v39 = vsel %vm373_vm3, 1, %v4740_v1  ;;  %v413_v58 = vadd.s32 %v397_v56, %v317_v20  ;;  %v340_v20 = vpop.permute.xlu0 %339  ;;  %v294_v56 = vsel %vm278_vm13, 1, %v4740_v1 }
 0x16e   :  { %v405_v61 = vadd.s32 %v389_v39, %v3534_v7  ;;  %vm374_vm0 = vcmp.eq.s32.totalorder %v340_v20, %v3145_v51 }
 0x16f   :  { %v390_v30 = vsel %vm374_vm0, 1, %v4740_v1 }
 0x170   :  { %v457_v19 = vpop.permute.xlu1 %456  ;;  %v3716_v6 = vadd.s32 %v485_v27, %v405_v61  ;;  %v582_v61 = vsel %vm566_vm15, 1, %v4740_v1 }
 0x171   :  { %vm477_vm5 = vcmp.eq.s32.totalorder %v457_v19, %v3145_v51  ;;  %v4739_v19 = vrot.slane %v3505_v25, 2 }
 0x172   :  { %v493_v52 = vsel %vm477_vm5, 1, %v4740_v1  ;;  %vm183_vm5 = vcmp.eq.s32.totalorder %v3295_v46, %v3145_v51 }
 0x173   :  { %v509_v8 = vadd.s32 %v493_v52, %v413_v58 }
 0x175   :  { %v605_v23 = vadd.s32 %v589_v13, %v509_v8  ;;  %v3721_v22 = vpop.permute.xlu1 %94  ;;  %v198_v8 = vsel %vm182_vm9, 1, %v4740_v1 }
 0x176   :  { %vm111_vm9 = vcmp.eq.s32.totalorder %v3721_v22, %v3145_v51 }
 0x177   :  { %v3723_v7 = vcvt.s32.f32 %v605_v23 }
 0x179   :  { %4804 = vst [vmem:[#allocation22_spill] sm:$0xff] %v3723_v7  ;;  %v645_v39 = vrot.slane %v3723_v7, 1  ;;  %v729_v42 = vrot.slane %v3723_v7, 3  ;;  %v688_v52 = vrot.slane %v3723_v7, 2  ;;  %v811_v20 = vrot.slane %v3723_v7, 5 }
 0x17a   :  { %v3726_v35 = vpop.permute.xlu1 %174  ;;  %v893_v40 = vrot.slane %v3723_v7, 7 }
 0x17b   :  { %v3732_v36 = vsel %vm650_vm1, %v644_v47, %v645_v39  ;;  %v118_v47 = vsel %vm102_vm12, 1, %v4740_v1  ;;  %v3776_v38 = vsel %vm732_vm6, %v4736_v41, %v729_v42  ;;  %vm191_vm4 = vcmp.eq.s32.totalorder %v3726_v35, %v3145_v51 }
 0x17c   :  { %4805 = vst [vmem:[#allocation23_spill] sm:$0xff] %v3732_v36  ;;  %v214_v28 = vadd.s32 %v198_v8, %v118_v47  ;;  %v770_v8 = vrot.slane %v3723_v7, 4 }
 0x17e   :  { %v310_v58 = vadd.s32 %v294_v56, %v214_v28  ;;  %v4744_v56 = vrot.slane %v3505_v25, 4  ;;  %v4745_v28 = vrot.slane %v3505_v25, 7 }
 0x17f   :  { %v436_v23 = vpop.permute.xlu1 %435 }
 0x180   :  { %vm470_vm2 = vcmp.eq.s32.totalorder %v436_v23, %v3145_v51  ;;  %v406_v24 = vadd.s32 %v390_v30, %v310_v58  ;;  %v3782_v30 = vsel %vm691_vm7, %v4739_v19, %v688_v52  ;;  %v3788_v58 = vsel %vm814_vm8, %v4742_v43, %v811_v20 }
 0x181   :  { %v486_v23 = vsel %vm470_vm2, 1, %v4740_v1  ;;  %v3806_v12 = vsel %vm896_vm11, %v4745_v28, %v893_v40 }
 0x182   :  { %v502_v41 = vadd.s32 %v486_v23, %v406_v24  ;;  %4806 = vst [vmem:[#allocation24_spill] sm:$0xff] %v3806_v12 }
 0x184   :  { %v556_v27 = vpop.permute.xlu1 %555 }
 0x185   :  { %vm574_vm3 = vcmp.eq.s32.totalorder %v556_v27, %v3145_v51 }
 0x186   :  { %v590_v13 = vsel %vm574_vm3, 1, %v4740_v1 }
 0x187   :  { %v606_v47 = vadd.s32 %v590_v13, %v510_v15  ;;  %v630_v15 = vpack.c.bf16 %v3723_v7, %v3505_v25  ;;  %v852_v13 = vrot.slane %v3723_v7, 6 }
 0x189   :  { %v3765_v59 = vcvt.s32.f32 %v606_v47  ;;  %v3767_v57 = vpop.permute.xlu1 %70  ;;  %v3794_v47 = vsel %vm773_vm10, %v4744_v56, %v770_v8 }
 0x18a   :  { %vm103_vm0 = vcmp.eq.s32.totalorder %v3767_v57, %v3145_v51 }
 0x18b   :  { %v4746_v31 = vrot.slane %v3765_v59, 1  ;;  %v4747_v5 = vrot.slane %v3765_v59, 3  ;;  %v4748_v19 = vrot.slane %v3765_v59, 2  ;;  %v4749_v1 = vrot.slane %v3765_v59, 5 }
 0x18d   :  { %v3812_v24 = vsel %vm650_vm1, %v645_v39, %v4746_v31  ;;  %v3818_v23 = vsel %vm732_vm6, %v729_v42, %v4747_v5  ;;  %v3824_v56 = vsel %vm691_vm7, %v688_v52, %v4748_v19  ;;  %v3837_v42 = vsel %vm814_vm8, %v811_v20, %v4749_v1 }
 0x18e   :  { %4807 = vst [vmem:[#allocation25_spill] sm:$0xff] %v3812_v24  ;;  %v271_v43 = vpop.permute.xlu1 %270  ;;  %v673_v27 = vpack.c.bf16 %v3812_v24, %v3732_v36  ;;  %v598_v52 = vadd.s32 %v582_v61, %v502_v41  ;;  %v4808_v19 = vrot.slane %v3765_v59, 4  ;;  %v4809_v39 = vrot.slane %v3765_v59, 7 }
 0x18f   :  { %v4811_v41 = vrot.slane %v3765_v59, 6  ;;  %vm287_vm13 = vcmp.eq.s32.totalorder %v271_v43, %v3145_v51 }
 0x190   :  { %v3845_v28 = vsel %vm773_vm10, %v770_v8, %v4808_v19  ;;  %v3851_v31 = vsel %vm896_vm11, %v893_v40, %v4809_v39  ;;  %1662 = vmatprep.mubr.bf16.mxu1 %v673_v27  ;;  %v4813_v19 = vrot.slane %v3505_v25, 6  ;;  %v3877_v39 = vpop.permute.xlu0 %342 }
 0x191   :  { %4810 = vst [vmem:[#allocation26_spill] sm:$0xff] %v3851_v31  ;;  %v3861_v5 = vsel %vm855_vm14, %v852_v13, %v4811_v41  ;;  %1663 = vmatmul.mubr.bf16.gmra.mrb[8].mxu1 %v630_v15 }
 0x192   :  { %4812 = vst [vmem:[#allocation27_spill] sm:$0xff] %v3861_v5  ;;  %v3867_v8 = vsel %vm855_vm14, %v4813_v19, %v852_v13  ;;  %v3881_v13 = vcvt.s32.f32 %v598_v52  ;;  %v4815_v19 = vmov 0  }
 0x193   :  { %4814 = vst [vmem:[#allocation28_spill] sm:$0xff] %v3867_v8  ;;  %v529_v41 = vpop.permute.xlu1 %528  ;;  %v207_v35 = vsel %vm191_vm4, 1, %v4815_v19  ;;  %v3886_v15 = vsel %vm183_vm5, 1, %v4815_v19  ;;  %v127_v46 = vsel %vm111_vm9, 1, %v4815_v19  ;;  %v303_v7 = vsel %vm287_vm13, 1, %v4815_v19 }
 0x194   :  { %vm565_vm12 = vcmp.eq.s32.totalorder %v529_v41, %v3145_v51  ;;  %v3892_v20 = vpop.permute.xlu0 %558  ;;  %v223_v1 = vadd.s32 %v207_v35, %v127_v46  ;;  %v4757_v41 = vrot.slane %v3881_v13, 1  ;;  %v4819_v12 = vrot.slane %v3881_v13, 3 }
 0x195   :  { %v581_v27 = vsel %vm565_vm12, 1, %v4815_v19  ;;  %vm575_vm15 = vcmp.eq.s32.totalorder %v3892_v20, %v3145_v51  ;;  %v4823_v55 = vrot.slane %v3881_v13, 5  ;;  %vm375_vm5 = vcmp.eq.s32.totalorder %v3877_v39, %v3145_v51 }
 0x196   :  { %v597_v61 = vadd.s32 %v581_v27, %v3716_v6  ;;  %v4817_v27 = vrot.slane %v3576_v10, 1  ;;  %v319_v29 = vadd.s32 %v303_v7, %v223_v1  ;;  %v799_v20 = vrot.slane %v3407_v44, 5 }
 0x197   :  { %v4859_v24 = vrot.slane %v3881_v13, 1  ;;  %v4865_v4 = vrot.slane %v3881_v13, 5 }
 0x198   :  { %v3900_v40 = vcvt.s32.f32 %v597_v61  ;;  %v247_v5 = vpop.permute.xlu1 %246 }
 0x199   :  { %vm279_vm2 = vcmp.eq.s32.totalorder %v247_v5, %v3145_v51  ;;  %v4837_v5 = vrot.slane %v3413_v9, 3 }
 0x19a   :  { %4816 = vst [vmem:[#allocation29_spill] sm:$0xff] %v3900_v40  ;;  %v637_v43 = vrot.slane %v3900_v40, 1  ;;  %v626_v61 = vpack.c.bf16 %v3900_v40, %v3576_v10  ;;  %v721_v22 = vrot.slane %v3900_v40, 3  ;;  %v680_v35 = vrot.slane %v3900_v40, 2 }
 0x19b   :  { %v803_v46 = vrot.slane %v3900_v40, 5  ;;  %v762_v52 = vrot.slane %v3900_v40, 4  ;;  %v885_v14 = vrot.slane %v3900_v40, 7  ;;  %v844_v7 = vrot.slane %v3900_v40, 6 }
 0x19c   :  { %v3924_v8 = vsel %vm650_vm1, %v637_v43, %v4757_v41  ;;  %v3930_v6 = vsel %vm650_vm1, %v4817_v27, %v637_v43  ;;  %v3936_v31 = vsel %vm732_vm6, %v721_v22, %v4819_v12  ;;  %v3942_v36 = vsel %vm732_vm6, %v4820_v37, %v721_v22 }
 0x19d   :  { %4818 = vst [vmem:[#allocation30_spill] sm:$0xff] %v3930_v6  ;;  %v367_v41 = vpop.permute.xlu1 %366  ;;  %v669_v18 = vpack.c.bf16 %v3924_v8, %v3930_v6  ;;  %v4821_v43 = vrot.slane %v3881_v13, 2  ;;  %v4822_v37 = vrot.slane %v3576_v10, 2  ;;  %v3966_v11 = vsel %vm814_vm8, %v803_v46, %v4823_v55 }
 0x19e   :  { %vm383_vm3 = vcmp.eq.s32.totalorder %v367_v41, %v3145_v51  ;;  %v4824_v27 = vrot.slane %v3576_v10, 5  ;;  %v4016_v1 = vsel %vm896_vm11, %v4829_v21, %v885_v14  ;;  %v717_v40 = vrot.slane %v3407_v44, 3 }
 0x19f   :  { %v3953_v12 = vsel %vm691_vm7, %v680_v35, %v4821_v43  ;;  %v3960_v22 = vsel %vm691_vm7, %v4822_v37, %v680_v35  ;;  %v399_v41 = vsel %vm383_vm3, 1, %v4815_v19  ;;  %1630 = vmatprep.mubr.bf16.mxu0 %v669_v18  ;;  %v4825_v37 = vrot.slane %v3881_v13, 4  ;;  %4830 = vst [vmem:[#allocation32_spill] sm:$0xff] %v4016_v1 }
 0x1a0   :  { %v3972_v43 = vsel %vm814_vm8, %v4824_v27, %v803_v46  ;;  %1631 = vmatmul.mubr.bf16.gmra.mrb[8].mxu0 %v626_v61  ;;  %v4826_v46 = vrot.slane %v3576_v10, 4  ;;  %v119_v35 = vsel %vm103_vm0, 1, %v4815_v19  ;;  %v4827_v18 = vrot.slane %v3881_v13, 7 }
 0x1a1   :  { %v3983_v55 = vsel %vm773_vm10, %v762_v52, %v4825_v37  ;;  %v415_v37 = vadd.s32 %v399_v41, %v319_v29  ;;  %v4831_v29 = vrot.slane %v3881_v13, 6 }
 0x1a2   :  { %v3989_v27 = vsel %vm773_vm10, %v4826_v46, %v762_v52  ;;  %v295_v52 = vsel %vm279_vm2, 1, %v4815_v19  ;;  %v463_v46 = vpop.permute.xlu1 %462  ;;  %v4010_v57 = vsel %vm896_vm11, %v885_v14, %v4827_v18  ;;  %v4833_v18 = vrot.slane %v3576_v10, 6 }
 0x1a3   :  { %4828 = vst [vmem:[#allocation31_spill] sm:$0xff] %v4010_v57  ;;  %vm479_vm4 = vcmp.eq.s32.totalorder %v463_v46, %v3145_v51  ;;  %v4025_v41 = vsel %vm855_vm14, %v844_v7, %v4831_v29  ;;  %v215_v14 = vadd.s32 %v3886_v15, %v119_v35  ;;  %v591_v46 = vsel %vm575_vm15, 1, %v4815_v19 }
 0x1a4   :  { %4832 = vst [vmem:[#allocation33_spill] sm:$0xff] %v4025_v41  ;;  %v4031_v61 = vsel %vm855_vm14, %v4833_v18, %v844_v7  ;;  %v495_v21 = vsel %vm479_vm4, 1, %v4815_v19  ;;  %v675_v10 = vrot.slane %v3413_v9, 2  ;;  %v798_v7 = vrot.slane %v3413_v9, 5 }
 0x1a5   :  { %4834 = vst [vmem:[#allocation34_spill] sm:$0xff] %v4031_v61  ;;  %v511_v29 = vadd.s32 %v495_v21, %v415_v37  ;;  %v311_v15 = vadd.s32 %v295_v52, %v215_v14  ;;  %v676_v18 = vrot.slane %v3407_v44, 2  ;;  %v4835_v37 = vrot.slane %v3417_v53, 3 }
 0x1a6   :  { %v439_v35 = vpop.permute.xlu1 %438  ;;  %v4836_v61 = vrot.slane %v3417_v53, 2  ;;  %v747_v41 = vsel %vm732_vm6, %v4837_v5, %v717_v40  ;;  %v4077_v14 = vsel %vm814_vm8, %v798_v7, %v799_v20 }
 0x1a7   :  { %v607_v1 = vadd.s32 %v591_v46, %v511_v29  ;;  %vm471_vm9 = vcmp.eq.s32.totalorder %v439_v35, %v3145_v51  ;;  %v746_v21 = vsel %vm732_vm6, %v717_v40, %v4835_v37  ;;  %v391_v29 = vsel %vm375_vm5, 1, %v4815_v19 }
 0x1a8   :  { %v4058_v39 = vsel %vm691_vm7, %v676_v18, %v4836_v61  ;;  %v487_v37 = vsel %vm471_vm9, 1, %v4815_v19  ;;  %v407_v57 = vadd.s32 %v391_v29, %v311_v15  ;;  %v749_v61 = vpack.c.bf16 %v746_v21, %v747_v41 }
 0x1a9   :  { %v4064_v35 = vcvt.s32.f32 %v607_v1  ;;  %v4073_v52 = vsel %vm691_vm7, %v675_v10, %v676_v18  ;;  %v828_v40 = vsel %vm814_vm8, %v799_v20, %v4838_v0  ;;  %v4839_v29 = vrot.slane %v3765_v59, 1 }
 0x1aa   :  { %v708_v6 = vpack.c.bf16 %v4058_v39, %v4073_v52  ;;  %v503_v41 = vadd.s32 %v487_v37, %v407_v57  ;;  %v4841_v52 = vrot.slane %v3413_v9, 1 }
 0x1ab   :  { %v535_v46 = vpop.permute.xlu1 %534  ;;  %v647_v1 = vrot.slane %v4064_v35, 1  ;;  %v690_v5 = vrot.slane %v4064_v35, 2  ;;  %v813_v15 = vrot.slane %v4064_v35, 5  ;;  %v772_v18 = vrot.slane %v4064_v35, 4 }
 0x1ac   :  { %vm567_vm12 = vcmp.eq.s32.totalorder %v535_v46, %v3145_v51  ;;  %v895_v51 = vrot.slane %v4064_v35, 7  ;;  %v4843_v46 = vrot.slane %v3765_v59, 2 }
 0x1ad   :  { %v583_v21 = vsel %vm567_vm12, 1, %v4815_v19  ;;  %v4095_v39 = vsel %vm650_vm1, %v4839_v29, %v647_v1  ;;  %v4101_v0 = vsel %vm650_vm1, %v647_v1, %v4841_v52  ;;  %v831_v19 = vpack.c.bf16 %v828_v40, %v4077_v14 }
 0x1ae   :  { %4840 = vst [vmem:[#allocation35_spill] sm:$0xff] %v4095_v39  ;;  %4842 = vst [vmem:[#allocation36_spill] sm:$0xff] %v4101_v0  ;;  %v599_v57 = vadd.s32 %v583_v21, %v503_v41  ;;  %v674_v20 = vpack.c.bf16 %v4101_v0, %v4095_v39  ;;  %v4111_v37 = vsel %vm691_vm7, %v4843_v46, %v690_v5  ;;  %v4845_v41 = vrot.slane %v3765_v59, 5 }
 0x1af   :  { %4844 = vst [vmem:[#allocation37_spill] sm:$0xff] %v4111_v37  ;;  %v631_v29 = vpack.c.bf16 %v4064_v35, %v3765_v59  ;;  %v4117_v1 = vsel %vm691_vm7, %v690_v5, %v675_v10  ;;  %v4127_v14 = vsel %vm814_vm8, %v813_v15, %v798_v7  ;;  %v4849_v5 = vrot.slane %v3765_v59, 4 }
 0x1b0   :  { %v4123_v21 = vsel %vm814_vm8, %v4845_v41, %v813_v15  ;;  %4847 = vst [vmem:[#allocation39_spill] sm:$0xff] %v4127_v14  ;;  %v4129_v40 = vcvt.s32.f32 %v599_v57  ;;  %1670 = vmatprep.mubr.bf16.mxu1 %v674_v20  ;;  %v4851_v41 = vrot.slane %v3413_v9, 4  ;;  %v4853_v57 = vrot.slane %v3765_v59, 7 }
 0x1b1   :  { %4846 = vst [vmem:[#allocation38_spill] sm:$0xff] %v4123_v21  ;;  %v4139_v46 = vsel %vm773_vm10, %v4849_v5, %v772_v18  ;;  %1671 = vmatmul.mubr.bf16.gmra.mrb[12].mxu1 %v631_v29  ;;  %v4855_v10 = vrot.slane %v3413_v9, 7  ;;  %v4861_v0 = vrot.slane %v3881_v13, 3  ;;  %v4866_v21 = vrot.slane %v3329_v48, 4 }
 0x1b2   :  { %4848 = vst [vmem:[#allocation40_spill] sm:$0xff] %v4129_v40  ;;  %4850 = vst [vmem:[#allocation41_spill] sm:$0xff] %v4139_v46  ;;  %v4145_v7 = vsel %vm773_vm10, %v772_v18, %v4851_v41  ;;  %v4153_v20 = vsel %vm896_vm11, %v4853_v57, %v895_v51  ;;  %1711 = vmatprep.mubr.bf16.mxu1 %v749_v61  ;;  %v639_v5 = vrot.slane %v4129_v40, 1  ;;  %v723_v41 = vrot.slane %v4129_v40, 3 }
 0x1b3   :  { %4852 = vst [vmem:[#allocation42_spill] sm:$0xff] %v4145_v7  ;;  %4854 = vst [vmem:[#allocation43_spill] sm:$0xff] %v4153_v20  ;;  %v4159_v29 = vsel %vm896_vm11, %v895_v51, %v4855_v10  ;;  %v627_v18 = vpack.c.bf16 %v4129_v40, %v3881_v13  ;;  %v682_v15 = vrot.slane %v4129_v40, 2  ;;  %v805_v52 = vrot.slane %v4129_v40, 5 }
 0x1b4   :  { %4856 = vst [vmem:[#allocation44_spill] sm:$0xff] %v4159_v29  ;;  %v764_v57 = vrot.slane %v4129_v40, 4  ;;  %v887_v51 = vrot.slane %v4129_v40, 7  ;;  %v4857_v61 = vrot.slane %v3329_v48, 1  ;;  %v4181_v39 = vsel %vm650_vm1, %v4859_v24, %v639_v5 }
 0x1b5   :  { %v4187_v60 = vsel %vm732_vm6, %v723_v41, %v4860_v3  ;;  %v4193_v46 = vsel %vm732_vm6, %v4861_v0, %v723_v41  ;;  %v4862_v24 = vrot.slane %v3329_v48, 2  ;;  %v4863_v3 = vrot.slane %v3881_v13, 2  ;;  %v2828_v0 = vld [vmem:[#allocation2 + $0x180] sm:$0xff]  }
 0x1b6   :  { %v4175_v10 = vsel %vm650_vm1, %v639_v5, %v4857_v61  ;;  %v4869_v41 = vrot.slane %v3881_v13, 7  ;;  %v4875_v20 = vrot.slane %v3413_v9, 6 }
 0x1b7   :  { %4858 = vst [vmem:[#allocation45_spill] sm:$0xff] %v4175_v10  ;;  %v670_v61 = vpack.c.bf16 %v4175_v10, %v4181_v39  ;;  %v4203_v5 = vsel %vm691_vm7, %v682_v15, %v4862_v24  ;;  %v4209_v26 = vsel %vm691_vm7, %v4863_v3, %v682_v15  ;;  %v4864_v10 = vrot.slane %v3329_v48, 5  ;;  %v2831_v3 = vld [vmem:[#allocation2 + $0x1c8] sm:$0xff]  }
 0x1b8   :  { %v4223_v24 = vsel %vm814_vm8, %v4865_v4, %v805_v52  ;;  %v4229_v15 = vsel %vm773_vm10, %v764_v57, %v4866_v21  ;;  %v4253_v37 = vsel %vm896_vm11, %v4869_v41, %v887_v51  ;;  %v758_v4 = vrot.slane %v3407_v44, 4  ;;  %v2832_v41 = vld [vmem:[#allocation2 + $0x188] sm:$0xff]  }
 0x1b9   :  { %v4217_v7 = vsel %vm814_vm8, %v805_v52, %v4864_v10  ;;  %1638 = vmatprep.mubr.bf16.mxu0 %v670_v61  ;;  %v4867_v10 = vrot.slane %v3881_v13, 4  ;;  %v4868_v52 = vrot.slane %v3329_v48, 7  ;;  %1712 = vmatmul.mubr.bf16.vlgmr.msra.gmra.mrb[16].mxu1 %v708_v6  ;;  %v854_v61 = vrot.slane %v4064_v35, 6 }
 0x1ba   :  { %1639 = vmatmul.mubr.bf16.gmra.mrb[12].mxu0 %v627_v18  ;;  %2578 = vmatpush3.bf16.msra.mxu1 %v2828_v0  ;;  %v2830_v0 = vld [vmem:[#allocation2 + $0x200] sm:$0xff]  }
 0x1bb   :  { %v4237_v14 = vsel %vm773_vm10, %v4867_v10, %v764_v57  ;;  %v4245_v21 = vsel %vm896_vm11, %v887_v51, %v4868_v52  ;;  %v846_v57 = vrot.slane %v4129_v40, 6  ;;  %v4785_v10 = vrot.slane %v3329_v48, 6  ;;  %1808 = vmatprep.mubr.bf16.mxu0 %v831_v19  ;;  %2579 = vmatprep.subr.bf16.mxu1 %v2831_v3  ;;  %v2833_v40 = vld [vmem:[#allocation2 + $0x248] sm:$0xff]  }
 0x1bc   :  { %v4870_v51 = vpack.c.bf16 %v3626_v16, %v3593_v34  ;;  %v4871_v19 = vrot.slane %v3881_v13, 6  ;;  %v4873_v52 = vrot.slane %v3417_v53, 4  ;;  %v2835_v16 = vld [vmem:[#allocation2 + $0x1d0] sm:$0xff]   ;;  %v4876_v3 = vrot.slane %v3413_v9, 4 }
 0x1bd   :  { %v4270_v6 = vsel %vm855_vm14, %v846_v57, %v4785_v10 }
 0x1be   :  { %1719 = vmatprep.mubr.bf16.mxu1 %v4870_v51  ;;  %v4276_v18 = vsel %vm855_vm14, %v4871_v19, %v846_v57  ;;  %v787_v34 = vsel %vm773_vm10, %v758_v4, %v4873_v52  ;;  %v4874_v51 = vrot.slane %v3765_v59, 6  ;;  %v4294_v57 = vsel %vm855_vm14, %v854_v61, %v4875_v20  ;;  %2580 = vmatpush3.bf16.msra.mxu1 %v2832_v41  ;;  %v2837_v41 = vld [vmem:[#allocation2 + $0x250] sm:$0xff]  }
 0x1bf   :  { %4872 = vst [vmem:[#allocation46_spill] sm:$0xff] %v4276_v18  ;;  %v788_v19 = vsel %vm773_vm10, %v4876_v3, %v758_v4  ;;  %2581 = vmatprep.subr.bf16.mxu1 %v2835_v16  ;;  %v2839_v18 = vld [vmem:[#allocation2 + $0x1d8] sm:$0xff]   ;;  %v4877_v20 = vpack.c.bf16 %v3632_v33, %v3606_v2  ;;  %v4878_v52 = vpack.c.bf16 %v3652_v50, %v3613_v32  ;;  %v2838_v16 = vld [vmem:[#allocation2 + $0x210] sm:$0xff]   ;;  %v2844_v33 = vld [vmem:[#allocation2 + $0x1a0] sm:$0xff]  }
 0x1c0   :  { %v4288_v10 = vsel %vm855_vm14, %v4874_v51, %v854_v61  ;;  %v790_v29 = vpack.c.bf16 %v787_v34, %v788_v19  ;;  %v2836_v51 = vld [vmem:[#allocation2 + $0x190] sm:$0xff]   ;;  %v2834_v61 = vld [vmem:[#allocation2 + $0x208] sm:$0xff]   ;;  %v4879_v4 = vpack.c.bf16 %v3936_v31, %v3942_v36  ;;  %v2840_v34 = vld [vmem:[#allocation2 + $0x198] sm:$0xff]   ;;  %v4880_v50 = vpack.c.bf16 %v3658_v45, %v3645_v49 }
 0x1c1   :  { %1720 = vmatmul.mubr.bf16.gmra.mrb[20].mxu1 %v4877_v20  ;;  %v2841_v2 = vld [vmem:[#allocation2 + $0x258] sm:$0xff]   ;;  %v2847_v32 = vld [vmem:[#allocation2 + $0x1e8] sm:$0xff]   ;;  %v4881_v31 = vpack.c.bf16 %v3953_v12, %v3960_v22  ;;  %v4882_v36 = vpack.c.bf16 %v3966_v11, %v3972_v43  ;;  %v726_v45 = vrot.slane %v3307_v63, 3  ;;  %v2845_v49 = vld [vmem:[#allocation2 + $0x260] sm:$0xff]   ;;  %v4884_v22 = vrot.slane %v3329_v48, 3 }
 0x1c2   :  { %1809 = vmatmul.mubr.bf16.vlgmr.msra.gmra.mrb[16].mxu0 %v790_v29  ;;  %1727 = vmatprep.mubr.bf16.mxu1 %v4879_v4  ;;  %v2843_v29 = vld [vmem:[#allocation2 + $0x1e0] sm:$0xff]   ;;  %v2851_v12 = vld [vmem:[#allocation2 + $0x1f0] sm:$0xff]   ;;  %v4885_v19 = vpack.c.bf16 %v3983_v55, %v3989_v27  ;;  %v2855_v20 = vld [vmem:[#allocation2 + $0x1f8] sm:$0xff]   ;;  %v4887_v4 = vpack.c.bf16 %v4217_v7, %v4223_v24  ;;  %v807_v55 = vrot.slane %v3320_v17, 5  ;;  %v808_v27 = vrot.slane %v3307_v63, 5 }
 0x1c3   :  { %2642 = vmatpush3.bf16.msra.mxu0 %v2830_v0  ;;  %1816 = vmatprep.mubr.bf16.mxu0 %v4878_v52  ;;  %v725_v0 = vrot.slane %v3320_v17, 3  ;;  %v2848_v52 = vld [vmem:[#allocation2 + $0x1a8] sm:$0xff]   ;;  %v2852_v3 = vld [vmem:[#allocation2 + $0x1b0] sm:$0xff]   ;;  %v4888_v7 = vrot.slane %v3329_v48, 2 }
 0x1c4   :  { %2643 = vmatprep.subr.bf16.mxu0 %v2833_v40  ;;  %2582 = vmatpush3.bf16.msra.mxu1 %v2836_v51  ;;  %v4883_v40 = vpack.c.bf16 %v4187_v60, %v4193_v46  ;;  %v2846_v60 = vld [vmem:[#allocation2 + $0x220] sm:$0xff]   ;;  %v2849_v46 = vld [vmem:[#allocation2 + $0x268] sm:$0xff]  }
 0x1c5   :  { %2583 = vmatprep.subr.bf16.mxu1 %v2839_v18  ;;  %v2842_v18 = vld [vmem:[#allocation2 + $0x218] sm:$0xff]   ;;  %v739_v11 = vsel %vm732_vm6, %v4884_v22, %v725_v0  ;;  %v738_v43 = vsel %vm732_vm6, %v725_v0, %v726_v45 }
 0x1c6   :  { %v753_v51 = vpack.c.bf16 %v738_v43, %v739_v11  ;;  %v809_v11 = vrot.slane %v3509_v62, 5  ;;  %v767_v43 = vrot.slane %v3307_v63, 4 }
 0x1c7   :  { %2644 = vmatpush3.bf16.msra.mxu0 %v2834_v61  ;;  %v4886_v61 = vpack.c.bf16 %v4203_v5, %v4209_v26  ;;  %v2853_v26 = vld [vmem:[#allocation2 + $0x270] sm:$0xff]   ;;  %v2856_v5 = vld [vmem:[#allocation2 + $0x1b8] sm:$0xff]  }
 0x1c8   :  { %2645 = vmatprep.subr.bf16.mxu0 %v2837_v41  ;;  %2584 = vmatpush3.bf16.msra.mxu1 %v2840_v34  ;;  %v727_v41 = vrot.slane %v3509_v62, 3  ;;  %v684_v34 = vrot.slane %v3320_v17, 2 }
 0x1c9   :  { %2585 = vmatprep.subr.bf16.mxu1 %v2843_v29  ;;  %1728 = vmatmul.mubr.bf16.gmra.mrb[24].mxu1 %v4881_v31  ;;  %v685_v29 = vrot.slane %v3307_v63, 2 }
 0x1ca   :  { %1817 = vmatmul.mubr.bf16.gmra.mrb[20].mxu0 %v4880_v50  ;;  %1735 = vmatprep.mubr.bf16.mxu1 %v4883_v40  ;;  %v698_v24 = vsel %vm691_vm7, %v4888_v7, %v684_v34  ;;  %v4890_v50 = vrot.slane %v3505_v25, 3  ;;  %v737_v31 = vsel %vm732_vm6, %v726_v45, %v727_v41  ;;  %v820_v40 = vsel %vm814_vm8, %v807_v55, %v808_v27 }
 0x1cb   :  { %1824 = vmatprep.mubr.bf16.mxu0 %v4882_v36  ;;  %2646 = vmatpush3.bf16.msra.mxu0 %v2838_v16  ;;  %v2850_v16 = vld [vmem:[#allocation2 + $0x228] sm:$0xff]   ;;  %v697_v36 = vsel %vm691_vm7, %v684_v34, %v685_v29  ;;  %v686_v45 = vrot.slane %v3509_v62, 2 }
 0x1cc   :  { %2647 = vmatprep.subr.bf16.mxu0 %v2841_v2  ;;  %2586 = vmatpush3.bf16.msra.mxu1 %v2844_v33  ;;  %v4889_v2 = vrot.slane %v3329_v48, 5  ;;  %v712_v0 = vpack.c.bf16 %v697_v36, %v698_v24  ;;  %v768_v24 = vrot.slane %v3509_v62, 4 }
 0x1cd   :  { %2587 = vmatprep.subr.bf16.mxu1 %v2847_v32  ;;  %v736_v32 = vsel %vm732_vm6, %v727_v41, %v4890_v50  ;;  %v4895_v50 = vpack.c.bf16 %v3818_v23, %v3776_v38 }
 0x1ce   :  { %v821_v33 = vsel %vm814_vm8, %v4889_v2, %v807_v55  ;;  %v754_v22 = vpack.c.bf16 %v736_v32, %v737_v31  ;;  %v4896_v32 = vrot.slane %v3505_v25, 4  ;;  %v778_v36 = vsel %vm773_vm10, %v767_v43, %v768_v24 }
 0x1cf   :  { %2648 = vmatpush3.bf16.msra.mxu0 %v2842_v18  ;;  %v2854_v18 = vld [vmem:[#allocation2 + $0x230] sm:$0xff]  }
 0x1d0   :  { %2649 = vmatprep.subr.bf16.mxu0 %v2845_v49  ;;  %2588 = vmatpush3.bf16.msra.mxu1 %v2848_v52  ;;  %v835_v49 = vpack.c.bf16 %v820_v40, %v821_v33  ;;  %v2857_v52 = vld [vmem:[#allocation2 + $0x278] sm:$0xff]   ;;  %v777_v31 = vsel %vm773_vm10, %v768_v24, %v4896_v32  ;;  %v4897_v40 = vrot.slane %v3765_v59, 3  ;;  %v4914_v24 = vld [vmem:[#allocation41_spill] sm:$0xff] }
 0x1d1   :  { %2589 = vmatprep.subr.bf16.mxu1 %v2851_v12  ;;  %1736 = vmatmul.mubr.bf16.gmra.mrb[28].mxu1 %v4886_v61  ;;  %v4891_v12 = vpack.c.bf16 %v4229_v15, %v4237_v14  ;;  %v4893_v15 = vrot.slane %v3505_v25, 2  ;;  %v795_v38 = vpack.c.bf16 %v777_v31, %v778_v36  ;;  %v921_v31 = vpack.c.bf16 %v3417_v53, %v3407_v44  ;;  %v4919_v36 = vld [vmem:[#allocation20_spill] sm:$0xff] }
 0x1d2   :  { %1825 = vmatmul.mubr.bf16.gmra.mrb[24].mxu0 %v4885_v19  ;;  %1743 = vmatprep.mubr.bf16.mxu1 %v753_v51  ;;  %v696_v51 = vsel %vm691_vm7, %v685_v29, %v686_v45 }
 0x1d3   :  { %1832 = vmatprep.mubr.bf16.mxu0 %v4887_v4  ;;  %2650 = vmatpush3.bf16.msra.mxu0 %v2846_v60  ;;  %v766_v60 = vrot.slane %v3320_v17, 4  ;;  %v695_v19 = vsel %vm691_vm7, %v686_v45, %v4893_v15  ;;  %v819_v4 = vsel %vm814_vm8, %v808_v27, %v809_v11  ;;  %v731_v27 = vrot.slane %v4064_v35, 3 }
 0x1d4   :  { %2651 = vmatprep.subr.bf16.mxu0 %v2849_v46  ;;  %2590 = vmatpush3.bf16.msra.mxu1 %v2852_v3  ;;  %v2858_v46 = vld [vmem:[#allocation2 + $0x238] sm:$0xff]   ;;  %v4892_v3 = vrot.slane %v3329_v48, 4  ;;  %v713_v7 = vpack.c.bf16 %v695_v19, %v696_v51  ;;  %v4901_v45 = vrot.slane %v3417_v53, 7  ;;  %v840_v19 = vrot.slane %v3407_v44, 6 }
 0x1d5   :  { %2591 = vmatprep.subr.bf16.mxu1 %v2855_v20  ;;  %v4894_v20 = vrot.slane %v3505_v25, 5  ;;  %v779_v34 = vsel %vm773_vm10, %v766_v60, %v767_v43  ;;  %vm2284_vm7 = vcmask 1042434  }
 0x1d6   :  { %v780_v14 = vsel %vm773_vm10, %v4892_v3, %v766_v60  ;;  %v4902_v60 = vrot.slane %v3413_v9, 7  ;;  %v4907_v3 = vld [vmem:[#allocation38_spill] sm:$0xff] }
 0x1d7   :  { %2652 = vmatpush3.bf16.msra.mxu0 %v2850_v16  ;;  %v818_v61 = vsel %vm814_vm8, %v809_v11, %v4894_v20  ;;  %v794_v16 = vpack.c.bf16 %v779_v34, %v780_v14  ;;  %vm2286_vm8 = vcmask 1043459  }
 0x1d8   :  { %2653 = vmatprep.subr.bf16.mxu0 %v2853_v26  ;;  %2592 = vmatpush3.bf16.msra.mxu1 %v2856_v5  ;;  %v836_v29 = vpack.c.bf16 %v818_v61, %v819_v4 }
 0x1d9   :  { %1744 = vmatmul.mubr.bf16.gmra.mrb[32].mxu1 %v712_v0  ;;  %v4898_v0 = vrot.slane %v3413_v9, 3 }
 0x1da   :  { %1833 = vmatmul.mubr.bf16.gmra.mrb[28].mxu0 %v4891_v12  ;;  %1751 = vmatprep.mubr.bf16.mxu1 %v754_v22  ;;  %v4900_v12 = vpack.c.bf16 %v3837_v42, %v3788_v58  ;;  %v881_v22 = vrot.slane %v3407_v44, 7  ;;  %v4904_v58 = vld [vmem:[#allocation37_spill] sm:$0xff] }
 0x1db   :  { %1840 = vmatprep.mubr.bf16.mxu0 %v835_v49  ;;  %2654 = vmatpush3.bf16.msra.mxu0 %v2854_v18  ;;  %v733_v18 = vsel %vm732_vm6, %v4897_v40, %v731_v27  ;;  %v748_v49 = vsel %vm732_vm6, %v731_v27, %v4898_v0  ;;  %v4905_v42 = vpack.c.bf16 %v4117_v1, %v4904_v58  ;;  %v4916_v27 = vld [vmem:[#allocation18_spill] sm:$0xff]  ;;  %v4920_v40 = vld [vmem:[#allocation21_spill] sm:$0xff]  ;;  %v890_v58 = vrot.slane %v3307_v63, 7 }
 0x1dc   :  { %2655 = vmatprep.subr.bf16.mxu0 %v2857_v52  ;;  %v756_v23 = vpack.c.bf16 %v748_v49, %v733_v18  ;;  %v4899_v52 = vpack.c.bf16 %v3824_v56, %v3782_v30  ;;  %v910_v11 = vsel %vm896_vm11, %v881_v22, %v4901_v45  ;;  %v911_v43 = vsel %vm896_vm11, %v4902_v60, %v881_v22  ;;  %v4922_v0 = vld [vmem:[#allocation30_spill] sm:$0xff]  ;;  %v4923_v49 = vld [vmem:[#allocation17_spill] sm:$0xff]  ;;  %v4928_v22 = vld [vmem:[#allocation15_spill] sm:$0xff] }
 0x1dd   :  { %v2425_v41 = vpop.f32.mrb[0].mxu1  ;;  %v4903_v56 = vpack.c.bf16 %v3845_v28, %v3794_v47  ;;  %v913_v30 = vpack.c.bf16 %v910_v11, %v911_v43  ;;  %v4909_v28 = vrot.slane %v3417_v53, 6  ;;  %v4921_v18 = vpack.c.bf16 %v4919_v36, %v4920_v40  ;;  %v4929_v45 = vld [vmem:[#allocation14_spill] sm:$0xff]  ;;  %v4931_v60 = vld [vmem:[#allocation33_spill] sm:$0xff] }
 0x1de   :  { %v2426_v55 = vpop.f32.mrb[1].mxu1  ;;  %v4930_v11 = vpack.c.bf16 %v4928_v22, %v4929_v45  ;;  %v4932_v43 = vld [vmem:[#allocation34_spill] sm:$0xff]  ;;  %v4934_v53 = vpack.c.bf16 %v4181_v39, %v3924_v8  ;;  %v4939_v39 = vld [vmem:[#allocation29_spill] sm:$0xff]  ;;  %v925_v36 = vpack.c.bf16 %v3307_v63, %v3320_v17  ;;  %vm2282_vm6 = vcmask 1041409  }
 0x1df   :  { %2656 = vmatpush3.bf16.msra.mxu0 %v2858_v46  ;;  %v4388_v26 = vadd.f32 %v2426_v55, %v2425_v41  ;;  %v2428_v5 = vpop.f32.mrb[2].mxu1  ;;  %v4906_v46 = vld [vmem:[#allocation39_spill] sm:$0xff]  ;;  %v869_v47 = vsel %vm855_vm14, %v840_v19, %v4909_v28  ;;  %v4910_v41 = vrot.slane %v3413_v9, 6  ;;  %v4933_v44 = vpack.c.bf16 %v4931_v60, %v4932_v43  ;;  %v4956_v43 = vld [vmem:[#allocation28_spill] sm:$0xff] }
 0x1e0   :  { %v2429_v2 = vpop.f32.mrb[3].mxu1  ;;  %v4908_v14 = vpack.c.bf16 %v4906_v46, %v4907_v3  ;;  %v4937_v3 = vld [vmem:[#allocation45_spill] sm:$0xff]  ;;  %v848_v28 = vrot.slane %v3320_v17, 6 }
 0x1e1   :  { %v4391_v33 = vadd.f32 %v2429_v2, %v2428_v5  ;;  %1752 = vmatmul.mubr.bf16.gmra.mrb[36].mxu1 %v713_v7  ;;  %v870_v34 = vsel %vm855_vm14, %v4910_v41, %v840_v19  ;;  %v4912_v5 = vld [vmem:[#allocation16_spill] sm:$0xff]  ;;  %v4940_v19 = vpack.c.bf16 %v3881_v13, %v4939_v39  ;;  %v4944_v13 = vrot.slane %v3505_v25, 7 }
 0x1e2   :  { %1841 = vmatmul.mubr.bf16.gmra.mrb[32].mxu0 %v794_v16  ;;  %1759 = vmatprep.mubr.bf16.mxu1 %v4895_v50  ;;  %v872_v55 = vpack.c.bf16 %v869_v47, %v870_v34  ;;  %v4911_v16 = vld [vmem:[#allocation10_spill] sm:$0xff]  ;;  %v4917_v50 = vld [vmem:[#allocation19_spill] sm:$0xff]  ;;  %v849_v47 = vrot.slane %v3307_v63, 6  ;;  %v926_v63 = vpack.c.bf16 %v3505_v25, %v3509_v62 }
 0x1e3   :  { %1848 = vmatprep.mubr.bf16.mxu0 %v836_v29  ;;  %v929_v7 = vpack.c.bf16 %v4912_v5, %v4911_v16  ;;  %v4913_v29 = vld [vmem:[#allocation42_spill] sm:$0xff]  ;;  %v4918_v32 = vpack.c.bf16 %v4916_v27, %v4917_v50  ;;  %v850_v50 = vrot.slane %v3509_v62, 6 }
 0x1e4   :  { %v4915_v2 = vpack.c.bf16 %v4913_v29, %v4914_v24  ;;  %v861_v5 = vsel %vm855_vm14, %v848_v28, %v849_v47  ;;  %v4946_v29 = vld [vmem:[#allocation8_spill] sm:$0xff]  ;;  %v4947_v24 = vld [vmem:[#allocation13_spill] sm:$0xff] }
 0x1e9   :  { %1760 = vmatmul.mubr.bf16.gmra.mrb[40].mxu1 %v4899_v52  ;;  %v4926_v52 = vld [vmem:[#allocation32_spill] sm:$0xff] }
 0x1ea   :  { %1849 = vmatmul.mubr.bf16.gmra.mrb[36].mxu0 %v795_v38  ;;  %1767 = vmatprep.mubr.bf16.mxu1 %v756_v23  ;;  %v4924_v38 = vpack.c.bf16 %v4922_v0, %v4923_v49  ;;  %v4925_v23 = vld [vmem:[#allocation31_spill] sm:$0xff]  ;;  %v4950_v49 = vld [vmem:[#allocation12_spill] sm:$0xff] }
 0x1eb   :  { %1856 = vmatprep.mubr.bf16.mxu0 %v4900_v12  ;;  %v4927_v12 = vpack.c.bf16 %v4925_v23, %v4926_v52  ;;  %v4949_v0 = vld [vmem:[#allocation23_spill] sm:$0xff]  ;;  %v4952_v52 = vld [vmem:[#allocation26_spill] sm:$0xff] }
 0x1f1   :  { %1768 = vmatmul.mubr.bf16.gmra.mrb[44].mxu1 %v4905_v42  ;;  %v4936_v42 = vrot.slane %v3329_v48, 7 }
 0x1f2   :  { %1857 = vmatmul.mubr.bf16.gmra.mrb[40].mxu0 %v4903_v56  ;;  %v2401_v15 = vpop.f32.mrb[0].mxu0  ;;  %1905 = vmatprep.mubr.bf16.mxu1 %v913_v30  ;;  %v4935_v56 = vpack.c.bf16 %v4245_v21, %v4253_v37  ;;  %v889_v30 = vrot.slane %v3320_v17, 7  ;;  %v4941_v21 = vld [vmem:[#allocation46_spill] sm:$0xff]  ;;  %v4955_v17 = vld [vmem:[#allocation27_spill] sm:$0xff] }
 0x1f3   :  { %1864 = vmatprep.mubr.bf16.mxu0 %v4908_v14  ;;  %v2402_v51 = vpop.f32.mrb[1].mxu0  ;;  %v4938_v14 = vld [vmem:[#allocation9_spill] sm:$0xff] }
 0x1f4   :  { %v4436_v20 = vadd.f32 %v2402_v51, %v2401_v15  ;;  %v2404_v61 = vpop.f32.mrb[2].mxu0  ;;  %v903_v46 = vsel %vm896_vm11, %v4936_v42, %v889_v30  ;;  %v932_v15 = vpack.c.bf16 %v4938_v14, %v4937_v3  ;;  %v902_v8 = vsel %vm896_vm11, %v889_v30, %v890_v58  ;;  %v4962_v42 = vld [vmem:[#allocation43_spill] sm:$0xff]  ;;  %v4964_v3 = vld [vmem:[#allocation36_spill] sm:$0xff] }
 0x1f5   :  { %v2405_v4 = vpop.f32.mrb[3].mxu0  ;;  %v917_v37 = vpack.c.bf16 %v902_v8, %v903_v46  ;;  %v4942_v51 = vpack.c.bf16 %v4270_v6, %v4941_v21  ;;  %v4965_v14 = vld [vmem:[#allocation11_spill] sm:$0xff]  ;;  %v4966_v8 = vld [vmem:[#allocation22_spill] sm:$0xff] }
 0x1f6   :  { %v4442_v1 = vadd.f32 %v2405_v4, %v2404_v61  ;;  %v891_v61 = vrot.slane %v3509_v62, 7  ;;  %v4943_v4 = vrot.slane %v3329_v48, 6  ;;  %v4967_v39 = vpack.c.bf16 %v3765_v59, %v4966_v8 }
 0x1f7   :  { %v928_v62 = vpack.c.bf16 %v3413_v9, %v4064_v35 }
 0x1f8   :  { %v862_v41 = vsel %vm855_vm14, %v4943_v4, %v848_v28  ;;  %v900_v34 = vsel %vm896_vm11, %v891_v61, %v4944_v13  ;;  %v901_v6 = vsel %vm896_vm11, %v890_v58, %v891_v61  ;;  %v4961_v58 = vld [vmem:[#allocation44_spill] sm:$0xff] }
 0x1f9   :  { %1906 = vmatmul.mubr.bf16.vlgmr.msra.gmra.mrb[48].mxu1 %v872_v55  ;;  %v4945_v55 = vld [vmem:[#allocation40_spill] sm:$0xff]  ;;  %v918_v27 = vpack.c.bf16 %v900_v34, %v901_v6  ;;  %v4963_v46 = vpack.c.bf16 %v4961_v58, %v4962_v42 }
 0x1fa   :  { %1865 = vmatmul.mubr.bf16.gmra.mrb[44].mxu0 %v4915_v2  ;;  %1913 = vmatprep.mubr.bf16.mxu1 %v4918_v32  ;;  %v924_v16 = vpack.c.bf16 %v3329_v48, %v4945_v55  ;;  %v933_v2 = vpack.c.bf16 %v4947_v24, %v4946_v29  ;;  %v4948_v32 = vrot.slane %v3505_v25, 6  ;;  %v860_v48 = vsel %vm855_vm14, %v849_v47, %v850_v50 }
 0x1fb   :  { %2002 = vmatprep.mubr.bf16.mxu0 %v929_v7  ;;  %v876_v7 = vpack.c.bf16 %v861_v5, %v862_v41  ;;  %v4968_v25 = vpack.c.bf16 %v4294_v57, %v4288_v10  ;;  %v1100_v24 = vsub.s32 0, %v3317_v54 }
 0x201   :  { %1914 = vmatmul.mubr.bf16.gmra.mrb[52].mxu1 %v4921_v18 }
 0x202   :  { %2003 = vmatmul.mubr.bf16.vlgmr.msra.gmra.mrb[48].mxu0 %v921_v31  ;;  %1921 = vmatprep.mubr.bf16.mxu1 %v4927_v12  ;;  %v859_v31 = vsel %vm855_vm14, %v850_v50, %v4948_v32  ;;  %v4953_v12 = vld [vmem:[#allocation24_spill] sm:$0xff] }
 0x203   :  { %2010 = vmatprep.mubr.bf16.mxu0 %v4924_v38  ;;  %v877_v40 = vpack.c.bf16 %v859_v31, %v860_v48  ;;  %v4951_v38 = vpack.c.bf16 %v4949_v0, %v4950_v49  ;;  %v4954_v22 = vpack.c.bf16 %v4952_v52, %v4953_v12 }
 0x209   :  { %1922 = vmatmul.mubr.bf16.gmra.mrb[56].mxu1 %v4933_v44  ;;  %v4957_v44 = vpack.c.bf16 %v4955_v17, %v4956_v43 }
 0x20a   :  { %2011 = vmatmul.mubr.bf16.gmra.mrb[52].mxu0 %v4930_v11  ;;  %1929 = vmatprep.mubr.bf16.mxu1 %v4935_v56  ;;  %v4959_v56 = vld [vmem:[#allocation25_spill] sm:$0xff] }
 0x20b   :  { %2018 = vmatprep.mubr.bf16.mxu0 %v4934_v53  ;;  %v4958_v53 = vld [vmem:[#allocation35_spill] sm:$0xff] }
 0x20c   :  { %v4960_v30 = vpack.c.bf16 %v4958_v53, %v4959_v56 }
 0x211   :  { %1930 = vmatmul.mubr.bf16.gmra.mrb[60].mxu1 %v4942_v51 }
 0x212   :  { %2019 = vmatmul.mubr.bf16.gmra.mrb[56].mxu0 %v4940_v19  ;;  %1937 = vmatprep.mubr.bf16.mxu1 %v917_v37 }
 0x213   :  { %2026 = vmatprep.mubr.bf16.mxu0 %v932_v15  ;;  %v936_v15 = vpack.c.bf16 %v4965_v14, %v4964_v3 }
 0x219   :  { %1938 = vmatmul.mubr.bf16.gmra.mrb[64].mxu1 %v876_v7 }
 0x21a   :  { %2027 = vmatmul.mubr.bf16.gmra.mrb[60].mxu0 %v924_v16  ;;  %1945 = vmatprep.mubr.bf16.mxu1 %v918_v27 }
 0x21b   :  { %2034 = vmatprep.mubr.bf16.mxu0 %v933_v2  ;;  %v4562_v2 = vld [vmem:[%s4721_s2] sm:$0x7]  ;;  %s2918_s2 = smov [#allocation5]  }
 0x21c   :  { %v4565_v50 = vrot.slane %v4562_v2, %v1100_v24  ;;  %s2296_s30 = sshll.u32 %s2918_s2, 4  ;;  %s2297_s30 = int_to_ptr.vmem [resolvable:$true] %s2296_s30 }
 0x21d   :  { %s2883_s4 = scalar_lea.vmem %s2297_s30, 64  ;;  %p2888_p9 = scmp.lt.s32.totalorder %s2297_s30, %s2297_s30 }
 0x21e   :  { %v1620_v52 = vadd.f32 %v4442_v1, %v4565_v50  ;;  %p2884_p8 = scmp.ne.s32.totalorder %s2297_s30, %s2883_s4  ;;  %p2889_p10 = scmp.lt.s32.totalorder %s2883_s4, %s2883_s4 }
 0x220   :  { %p2890_p11 = por %p2889_p10, %p2888_p9 }
 0x221   :  { %v2431_v18 = vpop.f32.mrb[4].mxu1  ;;  %1946 = vmatmul.mubr.bf16.gmra.mrb[68].mxu1 %v877_v40 }
 0x222   :  { %2035 = vmatmul.mubr.bf16.gmra.mrb[64].mxu0 %v925_v36  ;;  %v2432_v23 = vpop.f32.mrb[5].mxu1  ;;  %1953 = vmatprep.mubr.bf16.mxu1 %v4954_v22  ;;  %p2891_p12 = pnand %p2890_p11, %p2884_p8 }
 0x223   :  { %2042 = vmatprep.mubr.bf16.mxu0 %v4951_v38  ;;  %v4529_v45 = vadd.f32 %v2432_v23, %v2431_v18  ;;  %v2434_v11 = vpop.f32.mrb[6].mxu1  ;;  %v1617_v18 = vadd.f32 %v4436_v20, %v4565_v50 }
 0x224   :  { %v2435_v60 = vpop.f32.mrb[7].mxu1 }
 0x229   :  { %1954 = vmatmul.mubr.bf16.gmra.mrb[72].mxu1 %v4957_v44 }
 0x22a   :  { %2043 = vmatmul.mubr.bf16.gmra.mrb[68].mxu0 %v926_v63  ;;  %1961 = vmatprep.mubr.bf16.mxu1 %v4963_v46 }
 0x22b   :  { %2050 = vmatprep.mubr.bf16.mxu0 %v4960_v30 }
 0x231   :  { %1962 = vmatmul.mubr.bf16.gmra.mrb[76].mxu1 %v4968_v25 }
 0x232   :  { %2051 = vmatmul.mubr.bf16.gmra.mrb[72].mxu0 %v4967_v39 }
 0x233   :  { %2058 = vmatprep.mubr.bf16.mxu0 %v936_v15 }
 0x23a   :  { %2059 = vmatmul.mubr.bf16.gmra.mrb[76].mxu0 %v928_v62 }
 0x23d   :  { %v2407_v19 = vpop.f32.mrb[4].mxu0 }
 0x23e   :  { %v2408_v37 = vpop.f32.mrb[5].mxu0 }
 0x23f   :  { %v2409_v21 = vadd.f32 %v2408_v37, %v2407_v19  ;;  %v2410_v51 = vpop.f32.mrb[6].mxu0 }
 0x240   :  { %v2411_v61 = vpop.f32.mrb[7].mxu0 }
 0x241   :  { %v1625_v56 = vadd.f32 %v2409_v21, %v4565_v50 }
 0x264   :  { %v2437_v28 = vpop.f32.mrb[8].mxu1 }
 0x265   :  { %v2438_v47 = vpop.f32.mrb[9].mxu1 }
 0x266   :  { %v4552_v4 = vadd.f32 %v2438_v47, %v2437_v28  ;;  %v2440_v59 = vpop.f32.mrb[10].mxu1 }
 0x267   :  { %v2441_v41 = vpop.f32.mrb[11].mxu1 }
 0x268   :  { %v4554_v13 = vadd.f32 %v2441_v41, %v2440_v59 }
 0x273   :  { %v2413_v10 = vpop.f32.mrb[8].mxu0 }
 0x274   :  { %v2414_v57 = vpop.f32.mrb[9].mxu0 }
 0x275   :  { %v2415_v34 = vadd.f32 %v2414_v57, %v2413_v10  ;;  %v2416_v6 = vpop.f32.mrb[10].mxu0 }
 0x276   :  { %v2417_v55 = vpop.f32.mrb[11].mxu0 }
 0x277   :  { %v2418_v9 = vadd.f32 %v2417_v55, %v2416_v6  ;;  %v1633_v37 = vadd.f32 %v2415_v34, %v4565_v50 }
 0x279   :  { %v1636_v59 = vadd.f32 %v2418_v9, %v4565_v50 }
 0x284   :  { %v2443_v35 = vpop.f32.mrb[12].mxu1 }
 0x285   :  { %v2444_v16 = vpop.f32.mrb[13].mxu1 }
 0x286   :  { %v4556_v5 = vadd.f32 %v2444_v16, %v2443_v35  ;;  %v2446_v7 = vpop.f32.mrb[14].mxu1 }
 0x287   :  { %v2447_v29 = vpop.f32.mrb[15].mxu1 }
 0x28c   :  { %v2465_v31 = vpop.f32.mrb[16].mxu1 }
 0x28d   :  { %v2419_v27 = vpop.f32.mrb[12].mxu0  ;;  %v2466_v40 = vpop.f32.mrb[17].mxu1 }
 0x28e   :  { %v2420_v32 = vpop.f32.mrb[13].mxu0  ;;  %v2467_v0 = vadd.f32 %v2466_v40, %v2465_v31  ;;  %v2468_v38 = vpop.f32.mrb[18].mxu1 }
 0x28f   :  { %v2421_v48 = vadd.f32 %v2420_v32, %v2419_v27  ;;  %v2422_v36 = vpop.f32.mrb[14].mxu0  ;;  %v2469_v23 = vpop.f32.mrb[19].mxu1 }
 0x290   :  { %v2423_v49 = vpop.f32.mrb[15].mxu0  ;;  %v1714_v12 = vadd.f32 %v2467_v0, %v1617_v18  ;;  %v2470_v22 = vadd.f32 %v2469_v23, %v2468_v38 }
 0x291   :  { %v1641_v24 = vadd.f32 %v2421_v48, %v4565_v50 }
 0x292   :  { %v1717_v11 = vadd.f32 %v2470_v22, %v1620_v52  ;;  %v1649_v22 = vadd.f32 %v4388_v26, %v4565_v50  ;;  %v1657_v26 = vadd.f32 %v4529_v45, %v4565_v50 }
 0x294   :  { %v2471_v63 = vpop.f32.mrb[20].mxu1 }
 0x295   :  { %v2529_v60 = vpop.f32.mrb[16].mxu0  ;;  %v2472_v44 = vpop.f32.mrb[21].mxu1 }
 0x296   :  { %v2530_v17 = vpop.f32.mrb[17].mxu0  ;;  %v2473_v30 = vadd.f32 %v2472_v44, %v2471_v63  ;;  %v2474_v20 = vpop.f32.mrb[22].mxu1 }
 0x297   :  { %v2531_v43 = vadd.f32 %v2530_v17, %v2529_v60  ;;  %v2532_v53 = vpop.f32.mrb[18].mxu0  ;;  %v2475_v3 = vpop.f32.mrb[23].mxu1 }
 0x298   :  { %v2533_v58 = vpop.f32.mrb[19].mxu0  ;;  %v1722_v14 = vadd.f32 %v2473_v30, %v1625_v56 }
 0x299   :  { %v4572_v42 = vadd.f32 %v2531_v43, %v1714_v12  ;;  %v2534_v46 = vadd.f32 %v2533_v58, %v2532_v53  ;;  %v1652_v43 = vadd.f32 %v4391_v33, %v4565_v50 }
 0x29b   :  { %v4574_v1 = vadd.f32 %v2534_v46, %v1717_v11 }
 0x29c   :  { %v2477_v8 = vpop.f32.mrb[24].mxu1 }
 0x29d   :  { %v2535_v15 = vpop.f32.mrb[20].mxu0  ;;  %v2478_v62 = vpop.f32.mrb[25].mxu1 }
 0x29e   :  { %v2536_v39 = vpop.f32.mrb[21].mxu0  ;;  %v2479_v51 = vadd.f32 %v2478_v62, %v2477_v8  ;;  %v2480_v21 = vpop.f32.mrb[26].mxu1 }
 0x29f   :  { %v2537_v25 = vadd.f32 %v2536_v39, %v2535_v15  ;;  %v2538_v19 = vpop.f32.mrb[22].mxu0  ;;  %v2481_v47 = vpop.f32.mrb[27].mxu1 }
 0x2a0   :  { %v2539_v61 = vpop.f32.mrb[23].mxu0  ;;  %v1730_v41 = vadd.f32 %v2479_v51, %v1633_v37  ;;  %v2482_v10 = vadd.f32 %v2481_v47, %v2480_v21 }
 0x2a1   :  { %v4577_v28 = vadd.f32 %v2537_v25, %v1722_v14 }
 0x2a2   :  { %v1733_v57 = vadd.f32 %v2482_v10, %v1636_v59  ;;  %v1665_v10 = vadd.f32 %v4552_v4, %v4565_v50  ;;  %v1673_v4 = vadd.f32 %v4556_v5, %v4565_v50 }
 0x2a4   :  { %v2483_v55 = vpop.f32.mrb[28].mxu1 }
 0x2a5   :  { %v2541_v6 = vpop.f32.mrb[24].mxu0  ;;  %v2484_v7 = vpop.f32.mrb[29].mxu1 }
 0x2a6   :  { %v2542_v35 = vpop.f32.mrb[25].mxu0  ;;  %v2485_v34 = vadd.f32 %v2484_v7, %v2483_v55  ;;  %v2486_v27 = vpop.f32.mrb[30].mxu1 }
 0x2a7   :  { %v2543_v16 = vadd.f32 %v2542_v35, %v2541_v6  ;;  %v2544_v29 = vpop.f32.mrb[26].mxu0  ;;  %v2487_v40 = vpop.f32.mrb[31].mxu1 }
 0x2a8   :  { %v2545_v32 = vpop.f32.mrb[27].mxu0  ;;  %v1738_v18 = vadd.f32 %v2485_v34, %v1641_v24 }
 0x2a9   :  { %v4581_v31 = vadd.f32 %v2543_v16, %v1730_v41  ;;  %v2546_v36 = vadd.f32 %v2545_v32, %v2544_v29  ;;  %v1668_v16 = vadd.f32 %v4554_v13, %v4565_v50 }
 0x2ab   :  { %v4583_v9 = vadd.f32 %v2546_v36, %v1733_v57 }
 0x2ac   :  { %v2489_v49 = vpop.f32.mrb[32].mxu1 }
 0x2ad   :  { %v2547_v0 = vpop.f32.mrb[28].mxu0  ;;  %v2490_v52 = vpop.f32.mrb[33].mxu1 }
 0x2ae   :  { %v2548_v38 = vpop.f32.mrb[29].mxu0  ;;  %v2491_v48 = vadd.f32 %v2490_v52, %v2489_v49  ;;  %v2492_v11 = vpop.f32.mrb[34].mxu1 }
 0x2af   :  { %v2549_v23 = vadd.f32 %v2548_v38, %v2547_v0  ;;  %v2550_v12 = vpop.f32.mrb[30].mxu0  ;;  %v2493_v17 = vpop.f32.mrb[35].mxu1 }
 0x2b0   :  { %v2551_v60 = vpop.f32.mrb[31].mxu0  ;;  %v1746_v44 = vadd.f32 %v2491_v48, %v1649_v22  ;;  %v2494_v53 = vadd.f32 %v2493_v17, %v2492_v11 }
 0x2b1   :  { %v4587_v63 = vadd.f32 %v2549_v23, %v1738_v18 }
 0x2b2   :  { %v1749_v56 = vadd.f32 %v2494_v53, %v1652_v43 }
 0x2b4   :  { %v2495_v20 = vpop.f32.mrb[36].mxu1 }
 0x2b5   :  { %v2553_v30 = vpop.f32.mrb[32].mxu0  ;;  %v2496_v3 = vpop.f32.mrb[37].mxu1 }
 0x2b6   :  { %v2554_v58 = vpop.f32.mrb[33].mxu0  ;;  %v2497_v15 = vadd.f32 %v2496_v3, %v2495_v20  ;;  %v2498_v8 = vpop.f32.mrb[38].mxu1 }
 0x2b7   :  { %v2555_v46 = vadd.f32 %v2554_v58, %v2553_v30  ;;  %v2556_v14 = vpop.f32.mrb[34].mxu0  ;;  %v2499_v19 = vpop.f32.mrb[39].mxu1 }
 0x2b8   :  { %v2557_v39 = vpop.f32.mrb[35].mxu0  ;;  %v1754_v33 = vadd.f32 %v2497_v15, %v1657_v26 }
 0x2b9   :  { %v4593_v25 = vadd.f32 %v2555_v46, %v1746_v44  ;;  %v2558_v62 = vadd.f32 %v2557_v39, %v2556_v14 }
 0x2bb   :  { %v4595_v37 = vadd.f32 %v2558_v62, %v1749_v56 }
 0x2bc   :  { %v2501_v21 = vpop.f32.mrb[40].mxu1 }
 0x2bd   :  { %v2559_v51 = vpop.f32.mrb[36].mxu0  ;;  %v2502_v59 = vpop.f32.mrb[41].mxu1 }
 0x2be   :  { %v2560_v61 = vpop.f32.mrb[37].mxu0  ;;  %v2503_v45 = vadd.f32 %v2502_v59, %v2501_v21  ;;  %v2504_v57 = vpop.f32.mrb[42].mxu1 }
 0x2bf   :  { %v2561_v47 = vadd.f32 %v2560_v61, %v2559_v51  ;;  %v2562_v41 = vpop.f32.mrb[38].mxu0  ;;  %v2505_v35 = vpop.f32.mrb[43].mxu1 }
 0x2c0   :  { %v2563_v6 = vpop.f32.mrb[39].mxu0  ;;  %v1762_v7 = vadd.f32 %v2503_v45, %v1665_v10  ;;  %v2506_v29 = vadd.f32 %v2505_v35, %v2504_v57 }
 0x2c1   :  { %v4599_v55 = vadd.f32 %v2561_v47, %v1754_v33 }
 0x2c2   :  { %v1765_v24 = vadd.f32 %v2506_v29, %v1668_v16 }
 0x2c4   :  { %v2507_v27 = vpop.f32.mrb[44].mxu1 }
 0x2c5   :  { %v2565_v34 = vpop.f32.mrb[40].mxu0  ;;  %v2508_v40 = vpop.f32.mrb[45].mxu1 }
 0x2c6   :  { %v2566_v32 = vpop.f32.mrb[41].mxu0  ;;  %v2509_v0 = vadd.f32 %v2508_v40, %v2507_v27  ;;  %v2510_v49 = vpop.f32.mrb[46].mxu1 }
 0x2c7   :  { %v2567_v36 = vadd.f32 %v2566_v32, %v2565_v34  ;;  %v2568_v18 = vpop.f32.mrb[42].mxu0  ;;  %v2511_v12 = vpop.f32.mrb[47].mxu1 }
 0x2c8   :  { %v2569_v38 = vpop.f32.mrb[43].mxu0  ;;  %v1770_v13 = vadd.f32 %v2509_v0, %v1673_v4 }
 0x2c9   :  { %v4605_v23 = vadd.f32 %v2567_v36, %v1762_v7  ;;  %v2570_v52 = vadd.f32 %v2569_v38, %v2568_v18 }
 0x2cb   :  { %v4607_v22 = vadd.f32 %v2570_v52, %v1765_v24 }
 0x2cc   :  { %v2593_v60 = vpop.f32.mrb[48].mxu1 }
 0x2cd   :  { %v2571_v48 = vpop.f32.mrb[44].mxu0  ;;  %v2594_v44 = vpop.f32.mrb[49].mxu1 }
 0x2ce   :  { %v2572_v11 = vpop.f32.mrb[45].mxu0  ;;  %v2595_v53 = vadd.f32 %v2594_v44, %v2593_v60  ;;  %v2596_v30 = vpop.f32.mrb[50].mxu1 }
 0x2cf   :  { %v2573_v17 = vadd.f32 %v2572_v11, %v2571_v48  ;;  %v2574_v43 = vpop.f32.mrb[46].mxu0  ;;  %v2597_v50 = vpop.f32.mrb[51].mxu1 }
 0x2d0   :  { %v2575_v56 = vpop.f32.mrb[47].mxu0  ;;  %v1908_v20 = vadd.f32 %v2595_v53, %v4572_v42  ;;  %v2598_v58 = vadd.f32 %v2597_v50, %v2596_v30  ;;  %v4619_v42 = vadd.s32 16, %v3317_v54 }
 0x2d1   :  { %v4609_v5 = vadd.f32 %v2573_v17, %v1770_v13 }
 0x2d2   :  { %v1911_v46 = vadd.f32 %v2598_v58, %v4574_v1  ;;  %vm2072_vm1 = vcmp.lt.s32.totalorder %v4619_v42, 23 }
 0x2d4   :  { %v2599_v14 = vpop.f32.mrb[52].mxu1 }
 0x2d5   :  { %v2657_v3 = vpop.f32.mrb[48].mxu0  ;;  %v2600_v8 = vpop.f32.mrb[53].mxu1 }
 0x2d6   :  { %v2658_v26 = vpop.f32.mrb[49].mxu0  ;;  %v2601_v62 = vadd.f32 %v2600_v8, %v2599_v14  ;;  %v2602_v19 = vpop.f32.mrb[54].mxu1 }
 0x2d7   :  { %v2659_v15 = vadd.f32 %v2658_v26, %v2657_v3  ;;  %v2660_v39 = vpop.f32.mrb[50].mxu0  ;;  %v2603_v61 = vpop.f32.mrb[55].mxu1 }
 0x2d8   :  { %v2661_v33 = vpop.f32.mrb[51].mxu0  ;;  %v1916_v47 = vadd.f32 %v2601_v62, %v4577_v28 }
 0x2d9   :  { %v4613_v51 = vadd.f32 %v2659_v15, %v1908_v20  ;;  %v2662_v21 = vadd.f32 %v2661_v33, %v2660_v39 }
 0x2db   :  { %v4616_v59 = vadd.f32 %v2662_v21, %v1911_v46  ;;  %v2111_v1 = vmul.f32 %v4613_v51, %v4613_v51 }
 0x2dc   :  { %v2605_v57 = vpop.f32.mrb[56].mxu1 }
 0x2dd   :  { %v2090_v41 = vadd.f32 %v4616_v59, %v4613_v51  ;;  %v2112_v10 = vmul.f32 %v4616_v59, %v4616_v59  ;;  %v2663_v45 = vpop.f32.mrb[52].mxu0  ;;  %v2606_v28 = vpop.f32.mrb[57].mxu1 }
 0x2de   :  { %v2664_v6 = vpop.f32.mrb[53].mxu0  ;;  %v2607_v29 = vadd.f32 %v2606_v28, %v2605_v57  ;;  %v2608_v24 = vpop.f32.mrb[58].mxu1 }
 0x2df   :  { %v2127_v35 = vadd.f32 %v2112_v10, %v2111_v1  ;;  %v2665_v16 = vadd.f32 %v2664_v6, %v2663_v45  ;;  %v2666_v7 = vpop.f32.mrb[54].mxu0  ;;  %v2609_v32 = vpop.f32.mrb[59].mxu1 }
 0x2e0   :  { %v2667_v34 = vpop.f32.mrb[55].mxu0  ;;  %v1924_v36 = vadd.f32 %v2607_v29, %v4581_v31  ;;  %v2610_v40 = vadd.f32 %v2609_v32, %v2608_v24 }
 0x2e1   :  { %v4628_v27 = vadd.f32 %v2665_v16, %v1916_v47 }
 0x2e2   :  { %v1927_v49 = vadd.f32 %v2610_v40, %v4583_v9 }
 0x2e3   :  { %v2076_v18 = vsel %vm2072_vm1, %v4628_v27, 0.0 }
 0x2e4   :  { %v2091_v4 = vadd.f32 %v2090_v41, %v2076_v18  ;;  %v2113_v0 = vmul.f32 %v2076_v18, %v2076_v18  ;;  %v2611_v12 = vpop.f32.mrb[60].mxu1 }
 0x2e5   :  { %v2669_v38 = vpop.f32.mrb[56].mxu0  ;;  %v2612_v11 = vpop.f32.mrb[61].mxu1 }
 0x2e6   :  { %v2128_v52 = vadd.f32 %v2127_v35, %v2113_v0  ;;  %v2670_v13 = vpop.f32.mrb[57].mxu0  ;;  %v2613_v17 = vadd.f32 %v2612_v11, %v2611_v12  ;;  %v2614_v43 = vpop.f32.mrb[62].mxu1 }
 0x2e7   :  { %v2671_v48 = vadd.f32 %v2670_v13, %v2669_v38  ;;  %v2672_v60 = vpop.f32.mrb[58].mxu0  ;;  %v2615_v56 = vpop.f32.mrb[63].mxu1 }
 0x2e8   :  { %v2673_v44 = vpop.f32.mrb[59].mxu0  ;;  %v1932_v30 = vadd.f32 %v2613_v17, %v4587_v63 }
 0x2e9   :  { %v4635_v31 = vadd.f32 %v2671_v48, %v1924_v36  ;;  %v2674_v53 = vadd.f32 %v2673_v44, %v2672_v60 }
 0x2eb   :  { %v2093_v50 = vadd.f32 %v2091_v4, %v4635_v31  ;;  %v2115_v9 = vmul.f32 %v4635_v31, %v4635_v31  ;;  %v4641_v20 = vadd.f32 %v2674_v53, %v1927_v49 }
 0x2ec   :  { %v2617_v26 = vpop.f32.mrb[64].mxu1 }
 0x2ed   :  { %v2130_v58 = vadd.f32 %v2128_v52, %v2115_v9  ;;  %v2094_v46 = vadd.f32 %v2093_v50, %v4641_v20  ;;  %v2116_v3 = vmul.f32 %v4641_v20, %v4641_v20  ;;  %v2675_v14 = vpop.f32.mrb[60].mxu0  ;;  %v2618_v62 = vpop.f32.mrb[65].mxu1 }
 0x2ee   :  { %v2676_v15 = vpop.f32.mrb[61].mxu0  ;;  %v2619_v19 = vadd.f32 %v2618_v62, %v2617_v26  ;;  %v2620_v33 = vpop.f32.mrb[66].mxu1 }
 0x2ef   :  { %v2131_v8 = vadd.f32 %v2130_v58, %v2116_v3  ;;  %v2677_v39 = vadd.f32 %v2676_v15, %v2675_v14  ;;  %v2678_v63 = vpop.f32.mrb[62].mxu0  ;;  %v2621_v47 = vpop.f32.mrb[67].mxu1 }
 0x2f0   :  { %v2679_v21 = vpop.f32.mrb[63].mxu0  ;;  %v1940_v1 = vadd.f32 %v2619_v19, %v4593_v25  ;;  %v2622_v41 = vadd.f32 %v2621_v47, %v2620_v33 }
 0x2f1   :  { %v4646_v61 = vadd.f32 %v2677_v39, %v1932_v30 }
 0x2f2   :  { %v1943_v6 = vadd.f32 %v2622_v41, %v4595_v37 }
 0x2f3   :  { %v2080_v10 = vsel %vm2072_vm1, %v4646_v61, 0.0 }
 0x2f4   :  { %v2095_v45 = vadd.f32 %v2094_v46, %v2080_v10  ;;  %v2117_v57 = vmul.f32 %v2080_v10, %v2080_v10  ;;  %v2623_v28 = vpop.f32.mrb[68].mxu1 }
 0x2f5   :  { %v2681_v35 = vpop.f32.mrb[64].mxu0  ;;  %v2624_v24 = vpop.f32.mrb[69].mxu1 }
 0x2f6   :  { %v2132_v16 = vadd.f32 %v2131_v8, %v2117_v57  ;;  %v2682_v7 = vpop.f32.mrb[65].mxu0  ;;  %v2625_v32 = vadd.f32 %v2624_v24, %v2623_v28  ;;  %v2626_v36 = vpop.f32.mrb[70].mxu1 }
 0x2f7   :  { %v2683_v29 = vadd.f32 %v2682_v7, %v2681_v35  ;;  %v2684_v34 = vpop.f32.mrb[66].mxu0  ;;  %v2627_v4 = vpop.f32.mrb[71].mxu1 }
 0x2f8   :  { %v2685_v40 = vpop.f32.mrb[67].mxu0  ;;  %v1948_v0 = vadd.f32 %v2625_v32, %v4599_v55 }
 0x2f9   :  { %v4653_v25 = vadd.f32 %v2683_v29, %v1940_v1  ;;  %v2686_v18 = vadd.f32 %v2685_v40, %v2684_v34 }
 0x2fb   :  { %v2097_v49 = vadd.f32 %v2095_v45, %v4653_v25  ;;  %v2119_v37 = vmul.f32 %v4653_v25, %v4653_v25  ;;  %v4659_v38 = vadd.f32 %v2686_v18, %v1943_v6 }
 0x2fc   :  { %v2629_v11 = vpop.f32.mrb[72].mxu1 }
 0x2fd   :  { %v2134_v52 = vadd.f32 %v2132_v16, %v2119_v37  ;;  %v2098_v12 = vadd.f32 %v2097_v49, %v4659_v38  ;;  %v2120_v13 = vmul.f32 %v4659_v38, %v4659_v38  ;;  %v2687_v48 = vpop.f32.mrb[68].mxu0  ;;  %v2630_v44 = vpop.f32.mrb[73].mxu1 }
 0x2fe   :  { %v2688_v60 = vpop.f32.mrb[69].mxu0  ;;  %v2631_v53 = vadd.f32 %v2630_v44, %v2629_v11  ;;  %v2632_v56 = vpop.f32.mrb[74].mxu1 }
 0x2ff   :  { %v2135_v17 = vadd.f32 %v2134_v52, %v2120_v13  ;;  %v2689_v43 = vadd.f32 %v2688_v60, %v2687_v48  ;;  %v2690_v55 = vpop.f32.mrb[70].mxu0  ;;  %v2633_v9 = vpop.f32.mrb[75].mxu1 }
 0x300   :  { %v2691_v30 = vpop.f32.mrb[71].mxu0  ;;  %v1956_v58 = vadd.f32 %v2631_v53, %v4605_v23  ;;  %v2634_v46 = vadd.f32 %v2633_v9, %v2632_v56 }
 0x301   :  { %v4664_v50 = vadd.f32 %v2689_v43, %v1948_v0 }
 0x302   :  { %v1959_v15 = vadd.f32 %v2634_v46, %v4607_v22 }
 0x303   :  { %v2084_v3 = vsel %vm2072_vm1, %v4664_v50, 0.0 }
 0x304   :  { %v2099_v14 = vadd.f32 %v2098_v12, %v2084_v3  ;;  %v2121_v26 = vmul.f32 %v2084_v3, %v2084_v3  ;;  %v2635_v62 = vpop.f32.mrb[76].mxu1 }
 0x305   :  { %v2693_v8 = vpop.f32.mrb[72].mxu0  ;;  %v2636_v33 = vpop.f32.mrb[77].mxu1 }
 0x306   :  { %v2136_v39 = vadd.f32 %v2135_v17, %v2121_v26  ;;  %v2694_v63 = vpop.f32.mrb[73].mxu0  ;;  %v2637_v47 = vadd.f32 %v2636_v33, %v2635_v62  ;;  %v2638_v1 = vpop.f32.mrb[78].mxu1 }
 0x307   :  { %v2695_v19 = vadd.f32 %v2694_v63, %v2693_v8  ;;  %v2696_v21 = vpop.f32.mrb[74].mxu0  ;;  %v2639_v45 = vpop.f32.mrb[79].mxu1 }
 0x308   :  { %v2697_v41 = vpop.f32.mrb[75].mxu0  ;;  %v1964_v57 = vadd.f32 %v2637_v47, %v4609_v5 }
 0x309   :  { %v4671_v23 = vadd.f32 %v2695_v19, %v1956_v58  ;;  %v2698_v10 = vadd.f32 %v2697_v41, %v2696_v21 }
 0x30b   :  { %v2101_v6 = vadd.f32 %v2099_v14, %v4671_v23  ;;  %v2123_v22 = vmul.f32 %v4671_v23, %v4671_v23  ;;  %v4677_v35 = vadd.f32 %v2698_v10, %v1959_v15 }
 0x30d   :  { %v2138_v16 = vadd.f32 %v2136_v39, %v2123_v22  ;;  %v2102_v28 = vadd.f32 %v2101_v6, %v4677_v35  ;;  %v2124_v7 = vmul.f32 %v4677_v35, %v4677_v35  ;;  %v2699_v29 = vpop.f32.mrb[76].mxu0 }
 0x30e   :  { %v2700_v24 = vpop.f32.mrb[77].mxu0 }
 0x30f   :  { %v2139_v34 = vadd.f32 %v2138_v16, %v2124_v7  ;;  %v2701_v32 = vadd.f32 %v2700_v24, %v2699_v29  ;;  %v2702_v36 = vpop.f32.mrb[78].mxu0 }
 0x310   :  { %v2703_v40 = vpop.f32.mrb[79].mxu0 }
 0x311   :  { %v2061_v5 = vadd.f32 %v2701_v32, %v1964_v57 }
 0x313   :  { %v2088_v18 = vsel %vm2072_vm1, %v2061_v5, 0.0 }
 0x314   :  { %v2103_v4 = vadd.f32 %v2102_v28, %v2088_v18  ;;  %v2125_v0 = vmul.f32 %v2088_v18, %v2088_v18 }
 0x316   :  { %v2105_v49 = vrot.slane %v2103_v4, 4  ;;  %v2140_v37 = vadd.f32 %v2139_v34, %v2125_v0 }
 0x318   :  { %v2106_v52 = vadd.f32 %v2105_v49, %v2103_v4  ;;  %v2142_v12 = vrot.slane %v2140_v37, 4 }
 0x31a   :  { %v2107_v13 = vrot.slane %v2106_v52, 2  ;;  %v2143_v48 = vadd.f32 %v2142_v12, %v2140_v37 }
 0x31c   :  { %v2108_v11 = vadd.f32 %v2107_v13, %v2106_v52  ;;  %v2144_v60 = vrot.slane %v2143_v48, 2 }
 0x31e   :  { %v2109_v17 = vrot.slane %v2108_v11, 1  ;;  %v2145_v43 = vadd.f32 %v2144_v60, %v2143_v48 }
 0x320   :  { %v2110_v44 = vadd.f32 %v2109_v17, %v2108_v11  ;;  %v2146_v55 = vrot.slane %v2145_v43, 1 }
 0x322   :  { %v2147_v53 = vadd.f32 %v2146_v55, %v2145_v43  ;;  %v2148_v56 = vmul.f32 0.010869565, %v2110_v44 }
 0x324   :  { %v2149_v30 = vmul.f32 0.010869565, %v2147_v53  ;;  %v2150_v9 = vmul.f32 %v2148_v56, %v2148_v56  ;;  %v2166_v58 = vsub.f32 %v2061_v5, %v2148_v56  ;;  %v2152_v46 = vsub.f32 %v4613_v51, %v2148_v56 }
 0x325   :  { %v2153_v3 = vsub.f32 %v4616_v59, %v2148_v56  ;;  %v2154_v14 = vsub.f32 %v4628_v27, %v2148_v56  ;;  %v2156_v26 = vsub.f32 %v4635_v31, %v2148_v56  ;;  %v2157_v15 = vsub.f32 %v4641_v20, %v2148_v56 }
 0x326   :  { %v2151_v8 = vsub.f32 %v2149_v30, %v2150_v9  ;;  %v2158_v39 = vsub.f32 %v4646_v61, %v2148_v56  ;;  %v2160_v62 = vsub.f32 %v4653_v25, %v2148_v56  ;;  %v2161_v63 = vsub.f32 %v4659_v38, %v2148_v56 }
 0x327   :  { %v2162_v19 = vsub.f32 %v4664_v50, %v2148_v56  ;;  %v2164_v33 = vsub.f32 %v4671_v23, %v2148_v56  ;;  %v2165_v51 = vsub.f32 %v4677_v35, %v2148_v56  ;;  %v2188_v27 = vsub.s32 1, %v3317_v54 }
 0x328   :  { %v2168_v59 = vadd.f32 1e-05, %v2151_v8  ;;  %v2208_v31 = vsub.s32 2, %v3317_v54 }
 0x329   :  { %v2189_v20 = vrot.slane %v4562_v2, %v2188_v27 }
 0x32a   :  { %2859 = vrsqrt.f32 %v2168_v59  ;;  %v2209_v61 = vrot.slane %v4562_v2, %v2208_v31 }
 0x334   :  { %v2860_v21 = vpop.eup %2859 }
 0x335   :  { %v2184_v25 = vmul.f32 %v2860_v21, %v2166_v58  ;;  %v2170_v47 = vmul.f32 %v2860_v21, %v2152_v46  ;;  %v2171_v38 = vmul.f32 %v2860_v21, %v2153_v3  ;;  %v2172_v1 = vmul.f32 %v2860_v21, %v2154_v14 }
 0x336   :  { %v2174_v50 = vmul.f32 %v2860_v21, %v2156_v26  ;;  %v2175_v41 = vmul.f32 %v2860_v21, %v2157_v15  ;;  %v2176_v23 = vmul.f32 %v2860_v21, %v2158_v39  ;;  %v2178_v10 = vmul.f32 %v2860_v21, %v2160_v62 }
 0x337   :  { %v2204_v45 = vmul.f32 %v2189_v20, %v2184_v25  ;;  %v2179_v57 = vmul.f32 %v2860_v21, %v2161_v63  ;;  %v2180_v6 = vmul.f32 %v2860_v21, %v2162_v19  ;;  %v2182_v22 = vmul.f32 %v2860_v21, %v2164_v33 }
 0x338   :  { %v2183_v35 = vmul.f32 %v2860_v21, %v2165_v51  ;;  %v2190_v16 = vmul.f32 %v2189_v20, %v2170_v47  ;;  %v2191_v54 = vmul.f32 %v2189_v20, %v2171_v38  ;;  %v2192_v28 = vmul.f32 %v2189_v20, %v2172_v1 }
 0x339   :  { %v2194_v7 = vmul.f32 %v2189_v20, %v2174_v50  ;;  %v2195_v29 = vmul.f32 %v2189_v20, %v2175_v41  ;;  %v2196_v24 = vmul.f32 %v2189_v20, %v2176_v23  ;;  %v2198_v2 = vmul.f32 %v2189_v20, %v2178_v10 }
 0x33a   :  { %v2199_v34 = vmul.f32 %v2189_v20, %v2179_v57  ;;  %v2200_v32 = vmul.f32 %v2189_v20, %v2180_v6  ;;  %v2202_v36 = vmul.f32 %v2189_v20, %v2182_v22  ;;  %v2224_v40 = vadd.f32 %v2209_v61, %v2204_v45 }
 0x33b   :  { %v2203_v5 = vmul.f32 %v2189_v20, %v2183_v35  ;;  %v2210_v18 = vadd.f32 %v2209_v61, %v2190_v16  ;;  %v2211_v4 = vadd.f32 %v2209_v61, %v2191_v54  ;;  %v2212_v0 = vadd.f32 %v2209_v61, %v2192_v28 }
 0x33c   :  { %v2214_v49 = vadd.f32 %v2209_v61, %v2194_v7  ;;  %v2215_v37 = vadd.f32 %v2209_v61, %v2195_v29  ;;  %v2216_v52 = vadd.f32 %v2209_v61, %v2196_v24  ;;  %v2218_v12 = vadd.f32 %v2209_v61, %v2198_v2 }
 0x33d   :  { %v2219_v13 = vadd.f32 %v2209_v61, %v2199_v34  ;;  %v2220_v48 = vadd.f32 %v2209_v61, %v2200_v32  ;;  %v2222_v11 = vadd.f32 %v2209_v61, %v2202_v36  ;;  %v2223_v60 = vadd.f32 %v2209_v61, %v2203_v5 }
 0x33e   :  { %v2228_v17 = vsel %vm2072_vm1, %v2212_v0, -inf  ;;  %v2232_v43 = vsel %vm2072_vm1, %v2216_v52, -inf  ;;  %v2242_v44 = vmax.f32 %v2210_v18, %v2211_v4  ;;  %v2240_v55 = vsel %vm2072_vm1, %v2224_v40, -inf }
 0x33f   :  { %v2236_v53 = vsel %vm2072_vm1, %v2220_v48, -inf  ;;  %v2251_v56 = vmax.f32 %v2214_v49, %v2215_v37  ;;  %v2260_v30 = vmax.f32 %v2218_v12, %v2219_v13  ;;  %v2269_v58 = vmax.f32 %v2222_v11, %v2223_v60 }
 0x340   :  { %v2243_v9 = vmax.f32 %v2242_v44, %v2228_v17 }
 0x341   :  { %v2252_v46 = vmax.f32 %v2251_v56, %v2232_v43  ;;  %v2261_v3 = vmax.f32 %v2260_v30, %v2236_v53  ;;  %v2270_v26 = vmax.f32 %v2269_v58, %v2240_v55 }
 0x342   :  { %v2245_v14 = vrot.slane %v2243_v9, 4 }
 0x343   :  { %v2254_v15 = vrot.slane %v2252_v46, 4  ;;  %v2263_v8 = vrot.slane %v2261_v3, 4  ;;  %v2272_v62 = vrot.slane %v2270_v26, 4 }
 0x344   :  { %v2246_v39 = vmax.f32 %v2243_v9, %v2245_v14 }
 0x345   :  { %v2255_v63 = vmax.f32 %v2252_v46, %v2254_v15  ;;  %v2264_v19 = vmax.f32 %v2261_v3, %v2263_v8  ;;  %v2273_v51 = vmax.f32 %v2270_v26, %v2272_v62 }
 0x346   :  { %v2247_v33 = vrot.slane %v2246_v39, 2 }
 0x347   :  { %v2256_v59 = vrot.slane %v2255_v63, 2  ;;  %v2265_v27 = vrot.slane %v2264_v19, 2  ;;  %v2274_v31 = vrot.slane %v2273_v51, 2 }
 0x348   :  { %v2248_v42 = vmax.f32 %v2246_v39, %v2247_v33 }
 0x349   :  { %v2257_v20 = vmax.f32 %v2255_v63, %v2256_v59  ;;  %v2266_v21 = vmax.f32 %v2264_v19, %v2265_v27  ;;  %v2275_v25 = vmax.f32 %v2273_v51, %v2274_v31 }
 0x34a   :  { %v2249_v61 = vrot.slane %v2248_v42, 1 }
 0x34b   :  { %v2258_v47 = vrot.slane %v2257_v20, 1  ;;  %v2267_v38 = vrot.slane %v2266_v21, 1  ;;  %v2276_v50 = vrot.slane %v2275_v25, 1 }
 0x34c   :  { %v2250_v1 = vmax.f32 %v2248_v42, %v2249_v61 }
 0x34d   :  { %v2259_v41 = vmax.f32 %v2257_v20, %v2258_v47  ;;  %v2268_v23 = vmax.f32 %v2266_v21, %v2267_v38  ;;  %v2277_v10 = vmax.f32 %v2275_v25, %v2276_v50 }
 0x34f   :  { %v2283_v45 = vsel %vm2282_vm6, %v2259_v41, %v2250_v1 }
 0x350   :  { %v2285_v57 = vsel %vm2284_vm7, %v2268_v23, %v2283_v45 }
 0x351   :  { %v2287_v6 = vsel %vm2286_vm8, %v2277_v10, %v2285_v57 }
 0x352   :  { %2289 = vst [vmem:[#allocation5] sm:$0xf] %v2287_v6 }
 0x353   :  { %2894 = shalt.err (!%p2891_p12)
}
 0x354   :  { %s2895_s7 = scalar_lea.hbm %s4722_s3, 64 }
 0x355   :  { %p2896_p13 = scmp.ne.s32.totalorder %s4722_s3, %s2895_s7  ;;  %p2899_p0 = scmp.lt.u32.totalorder %s2895_s7, %s4722_s3 }
 0x357   :  { %p2901_p1 = pnand %p2899_p0, %p2896_p13 }
 0x359   :  { %2904 = shalt.err (!%p2901_p1)
}
 0x35a   :  { %2299 = dma.vmem_to_hbm [thread:$0]  %s2297_s30, 64, %s4722_s3, [#allocation4]  }
 0x35b   :  { %2907 = dma.done.wait [#allocation4], 64  }
 0x35c   :  { %2908 = vsyncadd [#allocation4], 4294967232 }
 0x35d   :  { %2303 = vsyncpa [#allocation3], 1 }
 0x35e   :  { %2304 = vsyncpa [#allocation4], 1 }

</bundles_post_ra>
